<compile_context>
chip_gen: v7x
topology: tpu7x:2x2x1
jax: 0.10.0
libtpu: 0.0.40
codegen_flags: <defaults>
</compile_context>

<pallas_src>
import functools

import jax
import jax.numpy as jnp
from jax.experimental import pallas as pl
from jax.experimental.pallas import tpu as pltpu

EPS = 1e-5
LP = 128            # lane padding for every feature dimension
NUM_W = 11          # number of (128,128) weight tiles in the weight slab
NUM_V_ROWS = 32     # rows in the (rows,128) vector slab (25 used, padded to 32)


# ----------------------------------------------------------------------------
# In-kernel helpers (traced inside the Pallas kernel body).
# ----------------------------------------------------------------------------
def _layernorm(x, gamma, beta, true_dim):
    # One-pass statistics; padded lanes of x are exactly zero, so dividing the
    # full-lane sums by the *true* dim reproduces unpadded LayerNorm exactly.
    # Padded lanes stay zero because gamma/beta are zero-padded.
    inv_n = 1.0 / float(true_dim)
    mu = jnp.sum(x, axis=-1, keepdims=True) * inv_n
    ex2 = jnp.sum(x * x, axis=-1, keepdims=True) * inv_n
    var = ex2 - mu * mu
    return (x - mu) * jax.lax.rsqrt(var + EPS) * gamma + beta


def _resblock(x, wa, ba, g, be, wb, bb, true_dim):
    # Input -> Linear -> ReLU -> LayerNorm -> (Dropout=id) -> Linear -> Add -> ReLU
    h = jnp.maximum(jnp.dot(x, wa, preferred_element_type=jnp.float32) + ba, 0.0)
    h = _layernorm(h, g, be, true_dim)
    h = jnp.dot(h, wb, preferred_element_type=jnp.float32) + bb
    return jnp.maximum(x + h, 0.0)


# ----------------------------------------------------------------------------
# Pallas kernel: whole DuelingDQN forward for one batch tile.
#   x_ref   : (TB, 128)            padded input tile
#   w_ref   : (128, NUM_W*128)     weight slab (lane-concatenated 128x128 tiles)
#   v_ref   : (NUM_V_ROWS, 128)    bias / gamma / beta / head-vector slab
#   out_ref : (TB, 128)            padded Q-value tile
# ----------------------------------------------------------------------------
def dueling_dqn_kernel(x_ref, w_ref, v_ref, out_ref, *, hidden_size, output_size):
    d2 = 2 * hidden_size

    def w(i):                                  # static, tile-aligned slice view
        return w_ref[:, pl.ds(i * LP, LP)]

    def vec(i):                                # (1,128) parameter row
        return v_ref[pl.ds(i, 1), :]

    x = x_ref[...]

    # --- input_net: Linear -> ReLU -> LayerNorm -> Dropout(id) ---
    h = jnp.maximum(jnp.dot(x, w(0), preferred_element_type=jnp.float32) + vec(0), 0.0)
    h = _layernorm(h, vec(1), vec(2), d2)

    # --- feature_net: Linear -> ReLU -> LayerNorm -> ResBlock -> ResBlock ---
    h = jnp.maximum(jnp.dot(h, w(1), preferred_element_type=jnp.float32) + vec(3), 0.0)
    h = _layernorm(h, vec(4), vec(5), hidden_size)
    h = _resblock(h, w(2), vec(6), vec(7), vec(8), w(3), vec(9), hidden_size)
    h = _resblock(h, w(4), vec(10), vec(11), vec(12), w(5), vec(13), hidden_size)

    # --- value / advantage streams: fused first linears of both ResBlocks ---
    w_both = w_ref[:, pl.ds(6 * LP, 2 * LP)]                  # [rb_v.wa | rb_a.wa]
    hb = jnp.dot(h, w_both, preferred_element_type=jnp.float32)   # (TB, 256)
    hv = jnp.maximum(hb[:, :LP] + vec(14), 0.0)
    ha = jnp.maximum(hb[:, LP:] + vec(18), 0.0)
    hv = _layernorm(hv, vec(15), vec(16), hidden_size)
    ha = _layernorm(ha, vec(19), vec(20), hidden_size)
    v_s = jnp.maximum(
        h + jnp.dot(hv, w(8), preferred_element_type=jnp.float32) + vec(17), 0.0)
    a_s = jnp.maximum(
        h + jnp.dot(ha, w(9), preferred_element_type=jnp.float32) + vec(21), 0.0)

    # --- value head: VPU multiply + cross-lane reduce (no (h,1) MXU matmul) ---
    values = jnp.sum(v_s * vec(22), axis=-1, keepdims=True)       # (TB, 1)

    # --- advantage head ---
    adv = jnp.dot(a_s, w(10), preferred_element_type=jnp.float32) + vec(24)  # (TB, 128)

    # --- dueling combination (mean over the TRUE output lanes; padded lanes 0) ---
    adv_mean = jnp.sum(adv, axis=-1, keepdims=True) * (1.0 / float(output_size))
    # vec(23) holds the value-head bias broadcast to all lanes.
    out_ref[...] = values + (adv - adv_mean) + vec(23)


# ----------------------------------------------------------------------------
# Parameter construction (deterministic, matches module __init__ shapes).
# Xavier-normal(gain=0.5) for Linear weights, zeros for biases,
# ones/zeros for LayerNorm gamma/beta.  (Unpadded, PyTorch-faithful.)
# ----------------------------------------------------------------------------
def _xavier_normal(key, fan_in, fan_out, gain=0.5):
    std = gain * (2.0 / (fan_in + fan_out)) ** 0.5
    return jax.random.normal(key, (fan_in, fan_out), dtype=jnp.float32) * std


def _linear_params(key, fan_in, fan_out):
    w = _xavier_normal(key, fan_in, fan_out)
    b = jnp.zeros((1, fan_out), dtype=jnp.float32)
    return w, b


def _ln_params(dim):
    return (jnp.ones((1, dim), dtype=jnp.float32),
            jnp.zeros((1, dim), dtype=jnp.float32))


def _resblock_params(key, hidden):
    k1, k2 = jax.random.split(key)
    wa, ba = _linear_params(k1, hidden, hidden)
    g, be = _ln_params(hidden)
    wb, bb = _linear_params(k2, hidden, hidden)
    return [wa, ba, g, be, wb, bb]


def make_params(key, input_size, hidden_size, output_size):
    keys = jax.random.split(key, 8)
    params = []

    # input_net: Linear(in, 2h) + LN(2h)
    w0, b0 = _linear_params(keys[0], input_size, hidden_size * 2)
    g0, be0 = _ln_params(hidden_size * 2)
    params += [w0, b0, g0, be0]

    # feature_net: Linear(2h, h) + LN(h) + 2 ResBlocks
    w1, b1 = _linear_params(keys[1], hidden_size * 2, hidden_size)
    g1, be1 = _ln_params(hidden_size)
    params += [w1, b1, g1, be1]
    params += _resblock_params(keys[2], hidden_size)
    params += _resblock_params(keys[3], hidden_size)

    # value_stream: ResBlock + Linear(h, 1)
    params += _resblock_params(keys[4], hidden_size)
    wv, bv = _linear_params(keys[5], hidden_size, 1)
    params += [wv, bv]

    # advantage_stream: ResBlock + Linear(h, out)
    params += _resblock_params(keys[6], hidden_size)
    wa, ba = _linear_params(keys[7], hidden_size, output_size)
    params += [wa, ba]

    return params


# ----------------------------------------------------------------------------
# Pack the 36 parameter tensors into two lane-dense slabs.
# ----------------------------------------------------------------------------
def _pad_mat(w):
    out = jnp.zeros((LP, LP), dtype=jnp.float32)
    return out.at[: w.shape[0], : w.shape[1]].set(w)


def _pad_row(v):
    v = jnp.reshape(v, (1, -1)).astype(jnp.float32)
    out = jnp.zeros((1, LP), dtype=jnp.float32)
    return out.at[:, : v.shape[1]].set(v)


def pack_params(params):
    (w0, b0, g0, be0, w1, b1, g1, be1, *rest) = params
    rb1, rb2 = rest[0:6], rest[6:12]
    rb_v, wv, bv = rest[12:18], rest[18], rest[19]
    rb_a, wah, bah = rest[20:26], rest[26], rest[27]

    # Weight slab: 11 tiles of (128,128) concatenated along lanes.
    # rb_v.wa and rb_a.wa adjacent (tiles 6,7) so the two streams' first
    # linears are one contiguous (128,256) slice.
    w_order = [w0, w1,
               rb1[0], rb1[4],
               rb2[0], rb2[4],
               rb_v[0], rb_a[0],
               rb_v[4], rb_a[4],
               wah]
    assert len(w_order) == NUM_W
    w_slab = jnp.concatenate([_pad_mat(w) for w in w_order], axis=1)

    # Vector slab: one 128-wide row per bias / gamma / beta / head vector.
    rows = [b0, g0, be0, b1, g1, be1,
            rb1[1], rb1[2], rb1[3], rb1[5],
            rb2[1], rb2[2], rb2[3], rb2[5],
            rb_v[1], rb_v[2], rb_v[3], rb_v[5],
            rb_a[1], rb_a[2], rb_a[3], rb_a[5]]
    rows = [_pad_row(r) for r in rows]
    rows.append(_pad_row(jnp.reshape(wv, (1, -1))))                    # 22: wv row
    rows.append(jnp.broadcast_to(jnp.reshape(bv, (1, 1)), (1, LP)))    # 23: bv bcast
    rows.append(_pad_row(bah))                                         # 24: adv bias
    v_slab = jnp.concatenate(rows, axis=0)
    v_slab = jnp.concatenate(
        [v_slab, jnp.zeros((NUM_V_ROWS - v_slab.shape[0], LP), jnp.float32)], axis=0)
    return w_slab, v_slab


# ----------------------------------------------------------------------------
# Wrapper: batch-tiled pallas_call, weights VMEM-resident across the grid.
# ----------------------------------------------------------------------------
@functools.partial(jax.jit, static_argnames=("input_size", "hidden_size", "output_size"))
def dueling_dqn_forward(x, w_slab, v_slab, *, input_size, hidden_size, output_size):
    batch = x.shape[0]
    if batch <= 256:
        tb = ((batch + 7) // 8) * 8          # single tile, sublane-aligned
        bp = tb
    else:
        tb = 256                              # pipelined / megacore-sharded tiles
        bp = ((batch + 255) // 256) * 256

    xp = jnp.zeros((bp, LP), dtype=jnp.float32).at[:batch, :input_size].set(
        x.astype(jnp.float32))

    kernel = functools.partial(dueling_dqn_kernel,
                               hidden_size=hidden_size,
                               output_size=output_size)

    out = pl.pallas_call(
        kernel,
        out_shape=jax.ShapeDtypeStruct((bp, LP), jnp.float32),
        grid_spec=pltpu.PrefetchScalarGridSpec(
            num_scalar_prefetch=0,
            grid=(bp // tb,),
            in_specs=[
                pl.BlockSpec((tb, LP), lambda i: (i, 0)),            # x tile
                pl.BlockSpec((LP, NUM_W * LP), lambda i: (0, 0)),    # weight slab
                pl.BlockSpec((NUM_V_ROWS, LP), lambda i: (0, 0)),    # vector slab
            ],
            out_specs=pl.BlockSpec((tb, LP), lambda i: (i, 0)),
        ),
        compiler_params=pltpu.CompilerParams(
            dimension_semantics=("parallel",)),
    )(xp, w_slab, v_slab)

    return out[:batch, :output_size]


# ----------------------------------------------------------------------------
# Pure-JAX reference (unpadded, two-pass LayerNorm) for a sanity check.
# ----------------------------------------------------------------------------
def reference_forward(x, params):
    (w0, b0, g0, be0, w1, b1, g1, be1, *rest) = params
    rb1, rb2 = rest[0:6], rest[6:12]
    rb_v, wv, bv = rest[12:18], rest[18], rest[19]
    rb_a, wa, ba = rest[20:26], rest[26], rest[27]

    def ln(x, g, b):
        mu = x.mean(-1, keepdims=True)
        var = ((x - mu) ** 2).mean(-1, keepdims=True)
        return (x - mu) / jnp.sqrt(var + EPS) * g + b

    def rb(x, wA, bA, g, be, wB, bB):
        h = jnp.maximum(x @ wA + bA, 0.0)
        h = ln(h, g, be)
        h = h @ wB + bB
        return jnp.maximum(x + h, 0.0)

    h = jnp.maximum(x @ w0 + b0, 0.0)
    h = ln(h, g0, be0)
    h = jnp.maximum(h @ w1 + b1, 0.0)
    h = ln(h, g1, be1)
    h = rb(h, *rb1)
    h = rb(h, *rb2)
    values = rb(h, *rb_v) @ wv + bv
    adv = rb(h, *rb_a) @ wa + ba
    return values + (adv - adv.mean(-1, keepdims=True))


if __name__ == "__main__":
    batch = 8
    input_size = 16
    hidden_size = 32
    output_size = 8

    key = jax.random.PRNGKey(0)
    kx, kp = jax.random.split(key)
    x = jax.random.normal(kx, (batch, input_size), dtype=jnp.float32)
    params = make_params(kp, input_size, hidden_size, output_size)
    w_slab, v_slab = pack_params(params)

    q = dueling_dqn_forward(x, w_slab, v_slab,
                            input_size=input_size,
                            hidden_size=hidden_size,
                            output_size=output_size)
    q = jax.block_until_ready(q)

    q_ref = reference_forward(x, params)
    assert q.shape == (batch, output_size)
    assert jnp.allclose(q, q_ref, atol=1e-3, rtol=1e-3), "mismatch vs reference"

    print("KERNEL_OK")
</pallas_src>

<mosaic_0001>
module attributes {stable_mosaic.version = 11 : i64} {
  func.func @dueling_dqn_kernel(%arg0: i32, %arg1: memref<8x128xf32, #tpu.memory_space<vmem>>, %arg2: memref<128x1408xf32, #tpu.memory_space<vmem>>, %arg3: memref<32x128xf32, #tpu.memory_space<vmem>>, %arg4: memref<8x128xf32, #tpu.memory_space<vmem>>) attributes {dimension_semantics = [#tpu.dimension_semantics<parallel>], iteration_bounds = array<i64: 1>, scalar_prefetch = 0 : i64, scratch_operands = 0 : i64, tpu.core_type = #tpu.core_type<tc>, window_params = [{transform_indices = @transform_0, window_bounds = array<i64: 8, 128>}, {pipeline_mode = #tpu.pipeline_mode<synchronous>, transform_indices = @transform_1, window_bounds = array<i64: 128, 1408>}, {pipeline_mode = #tpu.pipeline_mode<synchronous>, transform_indices = @transform_2, window_bounds = array<i64: 32, 128>}, {transform_indices = @transform_3, window_bounds = array<i64: 8, 128>}]} {
    %c0 = arith.constant 0 : index
    %c0_0 = arith.constant 0 : index
    %0 = vector.load %arg1[%c0, %c0_0] : memref<8x128xf32, #tpu.memory_space<vmem>>, vector<8x128xf32>
    %c0_1 = arith.constant 0 : index
    %c0_2 = arith.constant 0 : index
    %1 = vector.load %arg2[%c0_1, %c0_2] : memref<128x1408xf32, #tpu.memory_space<vmem>>, vector<128x128xf32>
    %cst = arith.constant dense<0.000000e+00> : vector<8x128xf32>
    %2 = tpu.matmul %0, %1, %cst {dimension_numbers = #tpu.dot_dimension_numbers<[1], [0], [0], [1], [0, 0, 1, 1], [], []>} : vector<8x128xf32>, vector<128x128xf32>, vector<8x128xf32> -> vector<8x128xf32>
    %c0_3 = arith.constant 0 : index
    %c0_4 = arith.constant 0 : index
    %3 = vector.load %arg3[%c0_3, %c0_4] : memref<32x128xf32, #tpu.memory_space<vmem>>, vector<1x128xf32>
    %4 = vector.broadcast %3 : vector<1x128xf32> to vector<8x128xf32>
    %5 = arith.addf %2, %4 : vector<8x128xf32>
    %cst_5 = arith.constant 0.000000e+00 : f32
    %6 = vector.broadcast %cst_5 : f32 to vector<8x128xf32>
    %7 = arith.maximumf %5, %6 : vector<8x128xf32>
    %c1 = arith.constant 1 : index
    %c0_6 = arith.constant 0 : index
    %8 = vector.load %arg3[%c1, %c0_6] : memref<32x128xf32, #tpu.memory_space<vmem>>, vector<1x128xf32>
    %c2 = arith.constant 2 : index
    %c0_7 = arith.constant 0 : index
    %9 = vector.load %arg3[%c2, %c0_7] : memref<32x128xf32, #tpu.memory_space<vmem>>, vector<1x128xf32>
    %cst_8 = arith.constant dense<0.000000e+00> : vector<8xf32>
    %10 = vector.multi_reduction <add>, %7, %cst_8 [1] : vector<8x128xf32> to vector<8xf32>
    %11 = vector.shape_cast %10 : vector<8xf32> to vector<8x1xf32>
    %cst_9 = arith.constant 1.562500e-02 : f32
    %12 = vector.broadcast %cst_9 : f32 to vector<8x1xf32>
    %13 = arith.mulf %11, %12 : vector<8x1xf32>
    %14 = arith.mulf %7, %7 : vector<8x128xf32>
    %cst_10 = arith.constant dense<0.000000e+00> : vector<8xf32>
    %15 = vector.multi_reduction <add>, %14, %cst_10 [1] : vector<8x128xf32> to vector<8xf32>
    %16 = vector.shape_cast %15 : vector<8xf32> to vector<8x1xf32>
    %cst_11 = arith.constant 1.562500e-02 : f32
    %17 = vector.broadcast %cst_11 : f32 to vector<8x1xf32>
    %18 = arith.mulf %16, %17 : vector<8x1xf32>
    %19 = arith.mulf %13, %13 : vector<8x1xf32>
    %20 = arith.subf %18, %19 : vector<8x1xf32>
    %21 = vector.broadcast %13 : vector<8x1xf32> to vector<8x128xf32>
    %22 = arith.subf %7, %21 : vector<8x128xf32>
    %cst_12 = arith.constant 9.99999974E-6 : f32
    %23 = vector.broadcast %cst_12 : f32 to vector<8x1xf32>
    %24 = arith.addf %20, %23 : vector<8x1xf32>
    %25 = math.rsqrt %24 : vector<8x1xf32>
    %26 = vector.broadcast %25 : vector<8x1xf32> to vector<8x128xf32>
    %27 = arith.mulf %22, %26 : vector<8x128xf32>
    %28 = vector.broadcast %8 : vector<1x128xf32> to vector<8x128xf32>
    %29 = arith.mulf %27, %28 : vector<8x128xf32>
    %30 = vector.broadcast %9 : vector<1x128xf32> to vector<8x128xf32>
    %31 = arith.addf %29, %30 : vector<8x128xf32>
    %c0_13 = arith.constant 0 : index
    %c128 = arith.constant 128 : index
    %32 = vector.load %arg2[%c0_13, %c128] : memref<128x1408xf32, #tpu.memory_space<vmem>>, vector<128x128xf32>
    %cst_14 = arith.constant dense<0.000000e+00> : vector<8x128xf32>
    %33 = tpu.matmul %31, %32, %cst_14 {dimension_numbers = #tpu.dot_dimension_numbers<[1], [0], [0], [1], [0, 0, 1, 1], [], []>} : vector<8x128xf32>, vector<128x128xf32>, vector<8x128xf32> -> vector<8x128xf32>
    %c3 = arith.constant 3 : index
    %c0_15 = arith.constant 0 : index
    %34 = vector.load %arg3[%c3, %c0_15] : memref<32x128xf32, #tpu.memory_space<vmem>>, vector<1x128xf32>
    %35 = vector.broadcast %34 : vector<1x128xf32> to vector<8x128xf32>
    %36 = arith.addf %33, %35 : vector<8x128xf32>
    %cst_16 = arith.constant 0.000000e+00 : f32
    %37 = vector.broadcast %cst_16 : f32 to vector<8x128xf32>
    %38 = arith.maximumf %36, %37 : vector<8x128xf32>
    %c4 = arith.constant 4 : index
    %c0_17 = arith.constant 0 : index
    %39 = vector.load %arg3[%c4, %c0_17] : memref<32x128xf32, #tpu.memory_space<vmem>>, vector<1x128xf32>
    %c5 = arith.constant 5 : index
    %c0_18 = arith.constant 0 : index
    %40 = vector.load %arg3[%c5, %c0_18] : memref<32x128xf32, #tpu.memory_space<vmem>>, vector<1x128xf32>
    %cst_19 = arith.constant dense<0.000000e+00> : vector<8xf32>
    %41 = vector.multi_reduction <add>, %38, %cst_19 [1] : vector<8x128xf32> to vector<8xf32>
    %42 = vector.shape_cast %41 : vector<8xf32> to vector<8x1xf32>
    %cst_20 = arith.constant 3.125000e-02 : f32
    %43 = vector.broadcast %cst_20 : f32 to vector<8x1xf32>
    %44 = arith.mulf %42, %43 : vector<8x1xf32>
    %45 = arith.mulf %38, %38 : vector<8x128xf32>
    %cst_21 = arith.constant dense<0.000000e+00> : vector<8xf32>
    %46 = vector.multi_reduction <add>, %45, %cst_21 [1] : vector<8x128xf32> to vector<8xf32>
    %47 = vector.shape_cast %46 : vector<8xf32> to vector<8x1xf32>
    %cst_22 = arith.constant 3.125000e-02 : f32
    %48 = vector.broadcast %cst_22 : f32 to vector<8x1xf32>
    %49 = arith.mulf %47, %48 : vector<8x1xf32>
    %50 = arith.mulf %44, %44 : vector<8x1xf32>
    %51 = arith.subf %49, %50 : vector<8x1xf32>
    %52 = vector.broadcast %44 : vector<8x1xf32> to vector<8x128xf32>
    %53 = arith.subf %38, %52 : vector<8x128xf32>
    %cst_23 = arith.constant 9.99999974E-6 : f32
    %54 = vector.broadcast %cst_23 : f32 to vector<8x1xf32>
    %55 = arith.addf %51, %54 : vector<8x1xf32>
    %56 = math.rsqrt %55 : vector<8x1xf32>
    %57 = vector.broadcast %56 : vector<8x1xf32> to vector<8x128xf32>
    %58 = arith.mulf %53, %57 : vector<8x128xf32>
    %59 = vector.broadcast %39 : vector<1x128xf32> to vector<8x128xf32>
    %60 = arith.mulf %58, %59 : vector<8x128xf32>
    %61 = vector.broadcast %40 : vector<1x128xf32> to vector<8x128xf32>
    %62 = arith.addf %60, %61 : vector<8x128xf32>
    %c0_24 = arith.constant 0 : index
    %c256 = arith.constant 256 : index
    %63 = vector.load %arg2[%c0_24, %c256] : memref<128x1408xf32, #tpu.memory_space<vmem>>, vector<128x128xf32>
    %c6 = arith.constant 6 : index
    %c0_25 = arith.constant 0 : index
    %64 = vector.load %arg3[%c6, %c0_25] : memref<32x128xf32, #tpu.memory_space<vmem>>, vector<1x128xf32>
    %c7 = arith.constant 7 : index
    %c0_26 = arith.constant 0 : index
    %65 = vector.load %arg3[%c7, %c0_26] : memref<32x128xf32, #tpu.memory_space<vmem>>, vector<1x128xf32>
    %c8 = arith.constant 8 : index
    %c0_27 = arith.constant 0 : index
    %66 = vector.load %arg3[%c8, %c0_27] : memref<32x128xf32, #tpu.memory_space<vmem>>, vector<1x128xf32>
    %c0_28 = arith.constant 0 : index
    %c384 = arith.constant 384 : index
    %67 = vector.load %arg2[%c0_28, %c384] : memref<128x1408xf32, #tpu.memory_space<vmem>>, vector<128x128xf32>
    %c9 = arith.constant 9 : index
    %c0_29 = arith.constant 0 : index
    %68 = vector.load %arg3[%c9, %c0_29] : memref<32x128xf32, #tpu.memory_space<vmem>>, vector<1x128xf32>
    %cst_30 = arith.constant dense<0.000000e+00> : vector<8x128xf32>
    %69 = tpu.matmul %62, %63, %cst_30 {dimension_numbers = #tpu.dot_dimension_numbers<[1], [0], [0], [1], [0, 0, 1, 1], [], []>} : vector<8x128xf32>, vector<128x128xf32>, vector<8x128xf32> -> vector<8x128xf32>
    %70 = vector.broadcast %64 : vector<1x128xf32> to vector<8x128xf32>
    %71 = arith.addf %69, %70 : vector<8x128xf32>
    %cst_31 = arith.constant 0.000000e+00 : f32
    %72 = vector.broadcast %cst_31 : f32 to vector<8x128xf32>
    %73 = arith.maximumf %71, %72 : vector<8x128xf32>
    %cst_32 = arith.constant dense<0.000000e+00> : vector<8xf32>
    %74 = vector.multi_reduction <add>, %73, %cst_32 [1] : vector<8x128xf32> to vector<8xf32>
    %75 = vector.shape_cast %74 : vector<8xf32> to vector<8x1xf32>
    %cst_33 = arith.constant 3.125000e-02 : f32
    %76 = vector.broadcast %cst_33 : f32 to vector<8x1xf32>
    %77 = arith.mulf %75, %76 : vector<8x1xf32>
    %78 = arith.mulf %73, %73 : vector<8x128xf32>
    %cst_34 = arith.constant dense<0.000000e+00> : vector<8xf32>
    %79 = vector.multi_reduction <add>, %78, %cst_34 [1] : vector<8x128xf32> to vector<8xf32>
    %80 = vector.shape_cast %79 : vector<8xf32> to vector<8x1xf32>
    %cst_35 = arith.constant 3.125000e-02 : f32
    %81 = vector.broadcast %cst_35 : f32 to vector<8x1xf32>
    %82 = arith.mulf %80, %81 : vector<8x1xf32>
    %83 = arith.mulf %77, %77 : vector<8x1xf32>
    %84 = arith.subf %82, %83 : vector<8x1xf32>
    %85 = vector.broadcast %77 : vector<8x1xf32> to vector<8x128xf32>
    %86 = arith.subf %73, %85 : vector<8x128xf32>
    %cst_36 = arith.constant 9.99999974E-6 : f32
    %87 = vector.broadcast %cst_36 : f32 to vector<8x1xf32>
    %88 = arith.addf %84, %87 : vector<8x1xf32>
    %89 = math.rsqrt %88 : vector<8x1xf32>
    %90 = vector.broadcast %89 : vector<8x1xf32> to vector<8x128xf32>
    %91 = arith.mulf %86, %90 : vector<8x128xf32>
    %92 = vector.broadcast %65 : vector<1x128xf32> to vector<8x128xf32>
    %93 = arith.mulf %91, %92 : vector<8x128xf32>
    %94 = vector.broadcast %66 : vector<1x128xf32> to vector<8x128xf32>
    %95 = arith.addf %93, %94 : vector<8x128xf32>
    %cst_37 = arith.constant dense<0.000000e+00> : vector<8x128xf32>
    %96 = tpu.matmul %95, %67, %cst_37 {dimension_numbers = #tpu.dot_dimension_numbers<[1], [0], [0], [1], [0, 0, 1, 1], [], []>} : vector<8x128xf32>, vector<128x128xf32>, vector<8x128xf32> -> vector<8x128xf32>
    %97 = vector.broadcast %68 : vector<1x128xf32> to vector<8x128xf32>
    %98 = arith.addf %96, %97 : vector<8x128xf32>
    %99 = arith.addf %62, %98 : vector<8x128xf32>
    %cst_38 = arith.constant 0.000000e+00 : f32
    %100 = vector.broadcast %cst_38 : f32 to vector<8x128xf32>
    %101 = arith.maximumf %99, %100 : vector<8x128xf32>
    %c0_39 = arith.constant 0 : index
    %c512 = arith.constant 512 : index
    %102 = vector.load %arg2[%c0_39, %c512] : memref<128x1408xf32, #tpu.memory_space<vmem>>, vector<128x128xf32>
    %c10 = arith.constant 10 : index
    %c0_40 = arith.constant 0 : index
    %103 = vector.load %arg3[%c10, %c0_40] : memref<32x128xf32, #tpu.memory_space<vmem>>, vector<1x128xf32>
    %c11 = arith.constant 11 : index
    %c0_41 = arith.constant 0 : index
    %104 = vector.load %arg3[%c11, %c0_41] : memref<32x128xf32, #tpu.memory_space<vmem>>, vector<1x128xf32>
    %c12 = arith.constant 12 : index
    %c0_42 = arith.constant 0 : index
    %105 = vector.load %arg3[%c12, %c0_42] : memref<32x128xf32, #tpu.memory_space<vmem>>, vector<1x128xf32>
    %c0_43 = arith.constant 0 : index
    %c640 = arith.constant 640 : index
    %106 = vector.load %arg2[%c0_43, %c640] : memref<128x1408xf32, #tpu.memory_space<vmem>>, vector<128x128xf32>
    %c13 = arith.constant 13 : index
    %c0_44 = arith.constant 0 : index
    %107 = vector.load %arg3[%c13, %c0_44] : memref<32x128xf32, #tpu.memory_space<vmem>>, vector<1x128xf32>
    %cst_45 = arith.constant dense<0.000000e+00> : vector<8x128xf32>
    %108 = tpu.matmul %101, %102, %cst_45 {dimension_numbers = #tpu.dot_dimension_numbers<[1], [0], [0], [1], [0, 0, 1, 1], [], []>} : vector<8x128xf32>, vector<128x128xf32>, vector<8x128xf32> -> vector<8x128xf32>
    %109 = vector.broadcast %103 : vector<1x128xf32> to vector<8x128xf32>
    %110 = arith.addf %108, %109 : vector<8x128xf32>
    %cst_46 = arith.constant 0.000000e+00 : f32
    %111 = vector.broadcast %cst_46 : f32 to vector<8x128xf32>
    %112 = arith.maximumf %110, %111 : vector<8x128xf32>
    %cst_47 = arith.constant dense<0.000000e+00> : vector<8xf32>
    %113 = vector.multi_reduction <add>, %112, %cst_47 [1] : vector<8x128xf32> to vector<8xf32>
    %114 = vector.shape_cast %113 : vector<8xf32> to vector<8x1xf32>
    %cst_48 = arith.constant 3.125000e-02 : f32
    %115 = vector.broadcast %cst_48 : f32 to vector<8x1xf32>
    %116 = arith.mulf %114, %115 : vector<8x1xf32>
    %117 = arith.mulf %112, %112 : vector<8x128xf32>
    %cst_49 = arith.constant dense<0.000000e+00> : vector<8xf32>
    %118 = vector.multi_reduction <add>, %117, %cst_49 [1] : vector<8x128xf32> to vector<8xf32>
    %119 = vector.shape_cast %118 : vector<8xf32> to vector<8x1xf32>
    %cst_50 = arith.constant 3.125000e-02 : f32
    %120 = vector.broadcast %cst_50 : f32 to vector<8x1xf32>
    %121 = arith.mulf %119, %120 : vector<8x1xf32>
    %122 = arith.mulf %116, %116 : vector<8x1xf32>
    %123 = arith.subf %121, %122 : vector<8x1xf32>
    %124 = vector.broadcast %116 : vector<8x1xf32> to vector<8x128xf32>
    %125 = arith.subf %112, %124 : vector<8x128xf32>
    %cst_51 = arith.constant 9.99999974E-6 : f32
    %126 = vector.broadcast %cst_51 : f32 to vector<8x1xf32>
    %127 = arith.addf %123, %126 : vector<8x1xf32>
    %128 = math.rsqrt %127 : vector<8x1xf32>
    %129 = vector.broadcast %128 : vector<8x1xf32> to vector<8x128xf32>
    %130 = arith.mulf %125, %129 : vector<8x128xf32>
    %131 = vector.broadcast %104 : vector<1x128xf32> to vector<8x128xf32>
    %132 = arith.mulf %130, %131 : vector<8x128xf32>
    %133 = vector.broadcast %105 : vector<1x128xf32> to vector<8x128xf32>
    %134 = arith.addf %132, %133 : vector<8x128xf32>
    %cst_52 = arith.constant dense<0.000000e+00> : vector<8x128xf32>
    %135 = tpu.matmul %134, %106, %cst_52 {dimension_numbers = #tpu.dot_dimension_numbers<[1], [0], [0], [1], [0, 0, 1, 1], [], []>} : vector<8x128xf32>, vector<128x128xf32>, vector<8x128xf32> -> vector<8x128xf32>
    %136 = vector.broadcast %107 : vector<1x128xf32> to vector<8x128xf32>
    %137 = arith.addf %135, %136 : vector<8x128xf32>
    %138 = arith.addf %101, %137 : vector<8x128xf32>
    %cst_53 = arith.constant 0.000000e+00 : f32
    %139 = vector.broadcast %cst_53 : f32 to vector<8x128xf32>
    %140 = arith.maximumf %138, %139 : vector<8x128xf32>
    %c0_54 = arith.constant 0 : index
    %c768 = arith.constant 768 : index
    %141 = vector.load %arg2[%c0_54, %c768] : memref<128x1408xf32, #tpu.memory_space<vmem>>, vector<128x256xf32>
    %cst_55 = arith.constant dense<0.000000e+00> : vector<8x256xf32>
    %142 = tpu.matmul %140, %141, %cst_55 {dimension_numbers = #tpu.dot_dimension_numbers<[1], [0], [0], [1], [0, 0, 1, 1], [], []>} : vector<8x128xf32>, vector<128x256xf32>, vector<8x256xf32> -> vector<8x256xf32>
    %143 = vector.extract_strided_slice %142 {offsets = [0, 0], sizes = [8, 128], strides = [1, 1]} : vector<8x256xf32> to vector<8x128xf32>
    %c14 = arith.constant 14 : index
    %c0_56 = arith.constant 0 : index
    %144 = vector.load %arg3[%c14, %c0_56] : memref<32x128xf32, #tpu.memory_space<vmem>>, vector<1x128xf32>
    %145 = vector.broadcast %144 : vector<1x128xf32> to vector<8x128xf32>
    %146 = arith.addf %143, %145 : vector<8x128xf32>
    %cst_57 = arith.constant 0.000000e+00 : f32
    %147 = vector.broadcast %cst_57 : f32 to vector<8x128xf32>
    %148 = arith.maximumf %146, %147 : vector<8x128xf32>
    %149 = vector.extract_strided_slice %142 {offsets = [0, 128], sizes = [8, 128], strides = [1, 1]} : vector<8x256xf32> to vector<8x128xf32>
    %c18 = arith.constant 18 : index
    %c0_58 = arith.constant 0 : index
    %150 = vector.load %arg3[%c18, %c0_58] : memref<32x128xf32, #tpu.memory_space<vmem>>, vector<1x128xf32>
    %151 = vector.broadcast %150 : vector<1x128xf32> to vector<8x128xf32>
    %152 = arith.addf %149, %151 : vector<8x128xf32>
    %cst_59 = arith.constant 0.000000e+00 : f32
    %153 = vector.broadcast %cst_59 : f32 to vector<8x128xf32>
    %154 = arith.maximumf %152, %153 : vector<8x128xf32>
    %c15 = arith.constant 15 : index
    %c0_60 = arith.constant 0 : index
    %155 = vector.load %arg3[%c15, %c0_60] : memref<32x128xf32, #tpu.memory_space<vmem>>, vector<1x128xf32>
    %c16 = arith.constant 16 : index
    %c0_61 = arith.constant 0 : index
    %156 = vector.load %arg3[%c16, %c0_61] : memref<32x128xf32, #tpu.memory_space<vmem>>, vector<1x128xf32>
    %cst_62 = arith.constant dense<0.000000e+00> : vector<8xf32>
    %157 = vector.multi_reduction <add>, %148, %cst_62 [1] : vector<8x128xf32> to vector<8xf32>
    %158 = vector.shape_cast %157 : vector<8xf32> to vector<8x1xf32>
    %cst_63 = arith.constant 3.125000e-02 : f32
    %159 = vector.broadcast %cst_63 : f32 to vector<8x1xf32>
    %160 = arith.mulf %158, %159 : vector<8x1xf32>
    %161 = arith.mulf %148, %148 : vector<8x128xf32>
    %cst_64 = arith.constant dense<0.000000e+00> : vector<8xf32>
    %162 = vector.multi_reduction <add>, %161, %cst_64 [1] : vector<8x128xf32> to vector<8xf32>
    %163 = vector.shape_cast %162 : vector<8xf32> to vector<8x1xf32>
    %cst_65 = arith.constant 3.125000e-02 : f32
    %164 = vector.broadcast %cst_65 : f32 to vector<8x1xf32>
    %165 = arith.mulf %163, %164 : vector<8x1xf32>
    %166 = arith.mulf %160, %160 : vector<8x1xf32>
    %167 = arith.subf %165, %166 : vector<8x1xf32>
    %168 = vector.broadcast %160 : vector<8x1xf32> to vector<8x128xf32>
    %169 = arith.subf %148, %168 : vector<8x128xf32>
    %cst_66 = arith.constant 9.99999974E-6 : f32
    %170 = vector.broadcast %cst_66 : f32 to vector<8x1xf32>
    %171 = arith.addf %167, %170 : vector<8x1xf32>
    %172 = math.rsqrt %171 : vector<8x1xf32>
    %173 = vector.broadcast %172 : vector<8x1xf32> to vector<8x128xf32>
    %174 = arith.mulf %169, %173 : vector<8x128xf32>
    %175 = vector.broadcast %155 : vector<1x128xf32> to vector<8x128xf32>
    %176 = arith.mulf %174, %175 : vector<8x128xf32>
    %177 = vector.broadcast %156 : vector<1x128xf32> to vector<8x128xf32>
    %178 = arith.addf %176, %177 : vector<8x128xf32>
    %c19 = arith.constant 19 : index
    %c0_67 = arith.constant 0 : index
    %179 = vector.load %arg3[%c19, %c0_67] : memref<32x128xf32, #tpu.memory_space<vmem>>, vector<1x128xf32>
    %c20 = arith.constant 20 : index
    %c0_68 = arith.constant 0 : index
    %180 = vector.load %arg3[%c20, %c0_68] : memref<32x128xf32, #tpu.memory_space<vmem>>, vector<1x128xf32>
    %cst_69 = arith.constant dense<0.000000e+00> : vector<8xf32>
    %181 = vector.multi_reduction <add>, %154, %cst_69 [1] : vector<8x128xf32> to vector<8xf32>
    %182 = vector.shape_cast %181 : vector<8xf32> to vector<8x1xf32>
    %cst_70 = arith.constant 3.125000e-02 : f32
    %183 = vector.broadcast %cst_70 : f32 to vector<8x1xf32>
    %184 = arith.mulf %182, %183 : vector<8x1xf32>
    %185 = arith.mulf %154, %154 : vector<8x128xf32>
    %cst_71 = arith.constant dense<0.000000e+00> : vector<8xf32>
    %186 = vector.multi_reduction <add>, %185, %cst_71 [1] : vector<8x128xf32> to vector<8xf32>
    %187 = vector.shape_cast %186 : vector<8xf32> to vector<8x1xf32>
    %cst_72 = arith.constant 3.125000e-02 : f32
    %188 = vector.broadcast %cst_72 : f32 to vector<8x1xf32>
    %189 = arith.mulf %187, %188 : vector<8x1xf32>
    %190 = arith.mulf %184, %184 : vector<8x1xf32>
    %191 = arith.subf %189, %190 : vector<8x1xf32>
    %192 = vector.broadcast %184 : vector<8x1xf32> to vector<8x128xf32>
    %193 = arith.subf %154, %192 : vector<8x128xf32>
    %cst_73 = arith.constant 9.99999974E-6 : f32
    %194 = vector.broadcast %cst_73 : f32 to vector<8x1xf32>
    %195 = arith.addf %191, %194 : vector<8x1xf32>
    %196 = math.rsqrt %195 : vector<8x1xf32>
    %197 = vector.broadcast %196 : vector<8x1xf32> to vector<8x128xf32>
    %198 = arith.mulf %193, %197 : vector<8x128xf32>
    %199 = vector.broadcast %179 : vector<1x128xf32> to vector<8x128xf32>
    %200 = arith.mulf %198, %199 : vector<8x128xf32>
    %201 = vector.broadcast %180 : vector<1x128xf32> to vector<8x128xf32>
    %202 = arith.addf %200, %201 : vector<8x128xf32>
    %c0_74 = arith.constant 0 : index
    %c1024 = arith.constant 1024 : index
    %203 = vector.load %arg2[%c0_74, %c1024] : memref<128x1408xf32, #tpu.memory_space<vmem>>, vector<128x128xf32>
    %cst_75 = arith.constant dense<0.000000e+00> : vector<8x128xf32>
    %204 = tpu.matmul %178, %203, %cst_75 {dimension_numbers = #tpu.dot_dimension_numbers<[1], [0], [0], [1], [0, 0, 1, 1], [], []>} : vector<8x128xf32>, vector<128x128xf32>, vector<8x128xf32> -> vector<8x128xf32>
    %205 = arith.addf %140, %204 : vector<8x128xf32>
    %c17 = arith.constant 17 : index
    %c0_76 = arith.constant 0 : index
    %206 = vector.load %arg3[%c17, %c0_76] : memref<32x128xf32, #tpu.memory_space<vmem>>, vector<1x128xf32>
    %207 = vector.broadcast %206 : vector<1x128xf32> to vector<8x128xf32>
    %208 = arith.addf %205, %207 : vector<8x128xf32>
    %cst_77 = arith.constant 0.000000e+00 : f32
    %209 = vector.broadcast %cst_77 : f32 to vector<8x128xf32>
    %210 = arith.maximumf %208, %209 : vector<8x128xf32>
    %c0_78 = arith.constant 0 : index
    %c1152 = arith.constant 1152 : index
    %211 = vector.load %arg2[%c0_78, %c1152] : memref<128x1408xf32, #tpu.memory_space<vmem>>, vector<128x128xf32>
    %cst_79 = arith.constant dense<0.000000e+00> : vector<8x128xf32>
    %212 = tpu.matmul %202, %211, %cst_79 {dimension_numbers = #tpu.dot_dimension_numbers<[1], [0], [0], [1], [0, 0, 1, 1], [], []>} : vector<8x128xf32>, vector<128x128xf32>, vector<8x128xf32> -> vector<8x128xf32>
    %213 = arith.addf %140, %212 : vector<8x128xf32>
    %c21 = arith.constant 21 : index
    %c0_80 = arith.constant 0 : index
    %214 = vector.load %arg3[%c21, %c0_80] : memref<32x128xf32, #tpu.memory_space<vmem>>, vector<1x128xf32>
    %215 = vector.broadcast %214 : vector<1x128xf32> to vector<8x128xf32>
    %216 = arith.addf %213, %215 : vector<8x128xf32>
    %cst_81 = arith.constant 0.000000e+00 : f32
    %217 = vector.broadcast %cst_81 : f32 to vector<8x128xf32>
    %218 = arith.maximumf %216, %217 : vector<8x128xf32>
    %c22 = arith.constant 22 : index
    %c0_82 = arith.constant 0 : index
    %219 = vector.load %arg3[%c22, %c0_82] : memref<32x128xf32, #tpu.memory_space<vmem>>, vector<1x128xf32>
    %220 = vector.broadcast %219 : vector<1x128xf32> to vector<8x128xf32>
    %221 = arith.mulf %210, %220 : vector<8x128xf32>
    %cst_83 = arith.constant dense<0.000000e+00> : vector<8xf32>
    %222 = vector.multi_reduction <add>, %221, %cst_83 [1] : vector<8x128xf32> to vector<8xf32>
    %223 = vector.shape_cast %222 : vector<8xf32> to vector<8x1xf32>
    %c0_84 = arith.constant 0 : index
    %c1280 = arith.constant 1280 : index
    %224 = vector.load %arg2[%c0_84, %c1280] : memref<128x1408xf32, #tpu.memory_space<vmem>>, vector<128x128xf32>
    %cst_85 = arith.constant dense<0.000000e+00> : vector<8x128xf32>
    %225 = tpu.matmul %218, %224, %cst_85 {dimension_numbers = #tpu.dot_dimension_numbers<[1], [0], [0], [1], [0, 0, 1, 1], [], []>} : vector<8x128xf32>, vector<128x128xf32>, vector<8x128xf32> -> vector<8x128xf32>
    %c24 = arith.constant 24 : index
    %c0_86 = arith.constant 0 : index
    %226 = vector.load %arg3[%c24, %c0_86] : memref<32x128xf32, #tpu.memory_space<vmem>>, vector<1x128xf32>
    %227 = vector.broadcast %226 : vector<1x128xf32> to vector<8x128xf32>
    %228 = arith.addf %225, %227 : vector<8x128xf32>
    %cst_87 = arith.constant dense<0.000000e+00> : vector<8xf32>
    %229 = vector.multi_reduction <add>, %228, %cst_87 [1] : vector<8x128xf32> to vector<8xf32>
    %230 = vector.shape_cast %229 : vector<8xf32> to vector<8x1xf32>
    %cst_88 = arith.constant 1.250000e-01 : f32
    %231 = vector.broadcast %cst_88 : f32 to vector<8x1xf32>
    %232 = arith.mulf %230, %231 : vector<8x1xf32>
    %233 = vector.broadcast %232 : vector<8x1xf32> to vector<8x128xf32>
    %234 = arith.subf %228, %233 : vector<8x128xf32>
    %235 = vector.broadcast %223 : vector<8x1xf32> to vector<8x128xf32>
    %236 = arith.addf %235, %234 : vector<8x128xf32>
    %c23 = arith.constant 23 : index
    %c0_89 = arith.constant 0 : index
    %237 = vector.load %arg3[%c23, %c0_89] : memref<32x128xf32, #tpu.memory_space<vmem>>, vector<1x128xf32>
    %238 = vector.broadcast %237 : vector<1x128xf32> to vector<8x128xf32>
    %239 = arith.addf %236, %238 : vector<8x128xf32>
    %c0_90 = arith.constant 0 : index
    %c0_91 = arith.constant 0 : index
    %240 = vector.load %arg4[%c0_90, %c0_91] : memref<8x128xf32, #tpu.memory_space<vmem>>, vector<8x128xf32>
    tpu.vector_store %arg4[%c0_90, %c0_91], %239 {strides = array<i32>} : memref<8x128xf32, #tpu.memory_space<vmem>>, vector<8x128xf32>,
    return
  }
  func.func @transform_0(%arg0: i32) -> (i32, i32) {
    %c0_i32 = arith.constant 0 : i32
    %c0_i32_0 = arith.constant 0 : i32
    return %arg0, %c0_i32 : i32, i32
  }
  func.func @transform_1(%arg0: i32) -> (i32, i32) {
    %c0_i32 = arith.constant 0 : i32
    %c0_i32_0 = arith.constant 0 : i32
    %c0_i32_1 = arith.constant 0 : i32
    return %c0_i32, %c0_i32_0 : i32, i32
  }
  func.func @transform_2(%arg0: i32) -> (i32, i32) {
    %c0_i32 = arith.constant 0 : i32
    %c0_i32_0 = arith.constant 0 : i32
    %c0_i32_1 = arith.constant 0 : i32
    return %c0_i32, %c0_i32_0 : i32, i32
  }
  func.func @transform_3(%arg0: i32) -> (i32, i32) {
    %c0_i32 = arith.constant 0 : i32
    %c0_i32_0 = arith.constant 0 : i32
    return %arg0, %c0_i32 : i32, i32
  }
}

</mosaic_0001>

<bundles_post_ra>
// kernel: dueling_dqn_forward.1
= control target key start
LH: loop header
LB: loop body
LE: loop exit
PB: predicated region body
PF: predicated region fallthrough
CT: control target
= control target key end

     0   :  { %8 = vsyncpa [#allocation3], 0  ;;  %s2233_s0 = inlined_call_operand.vmem [shape: f32[8,128], index: 0, kind: input, shape index: {}]   ;;  %s2234_s1 = inlined_call_operand.hbm [shape: f32[128,1408], index: 1, kind: input, shape index: {}]   ;;  %s2235_s2 = inlined_call_operand.vmem [shape: f32[32,128], index: 2, kind: input, shape index: {}]   ;;  %s2236_s3 = inlined_call_operand.hbm [shape: f32[8,128], index: 3, kind: output, shape index: {}]  }
   0x1   :  { %9 = vsyncpa [#allocation4], 0  ;;  %s1973_s12 = smov [#allocation2]   ;;  %s1925_s16 = scalar_lea.hbm %s2234_s1, 22528 }
   0x2   :  { %s17_s13 = sshll.u32 %s1973_s12, 4  ;;  %p1926_p0 = scmp.ne.s32.totalorder %s2234_s1, %s1925_s16  ;;  %s18_s13 = int_to_ptr.vmem [resolvable:$true] %s17_s13 }
   0x3   :  { %p1929_p1 = scmp.lt.u32.totalorder %s1925_s16, %s2234_s1 }
   0x5   :  { %p1931_p2 = pnand %p1929_p1, %p1926_p0 }
   0x7   :  { %1934 = shalt.err (!%p1931_p2)
}
   0x8   :  { %s1935_s21 = scalar_lea.vmem %s18_s13, 22528  ;;  %p1940_p4 = scmp.lt.s32.totalorder %s18_s13, %s18_s13 }
   0x9   :  { %p1936_p3 = scmp.ne.s32.totalorder %s18_s13, %s1935_s21  ;;  %p1941_p5 = scmp.lt.s32.totalorder %s1935_s21, %s1935_s21 }
   0xb   :  { %p1942_p6 = por %p1941_p5, %p1940_p4 }
   0xd   :  { %p1943_p7 = pnand %p1942_p6, %p1936_p3 }
   0xf   :  { %1946 = shalt.err (!%p1943_p7)
}
  0x10   :  { %s1974_s22 = smov 1408   ;;  %s1975_s23 = smov 88  }
  0x11   :  { %23 = dma.hbm_to_vmem [thread:$0]  %s2234_s1, 22528, %s18_s13, [#allocation3], %s1974_s22, %s1974_s22, %s1975_s23  }
  0x12   :  { %1969 = dma.done.wait [#allocation3], 22528  }
  0x13   :  { %1970 = vsyncadd [#allocation3], 4294944768  ;;  %v1976_v0 = vmov 0.0|0.0   ;;  %vm1977_vm0 = vmmov 0   ;;  %v1978_v1 = vmov 0.0   ;;  %v30_v2 = vld [vmem:[#allocation2] sm:$0xff] }
  0x14   :  { %1658 = vmatprep.subr.bf16.mxu0 %v1976_v0  ;;  %1375 = vmatprep.mubr.msk.f32.mxu0 %vm1977_vm0, %v1978_v1  ;;  %v31_v3 = vld [vmem:[#allocation2 + $0x58] sm:$0xff]  ;;  %v32_v4 = vld [vmem:[#allocation2 + $0xb0] sm:$0xff]  ;;  %v33_v6 = vld [vmem:[#allocation2 + $0x108] sm:$0xff]  ;;  %s1979_s20 = smov [#allocation5]  }
  0x15   :  { %1682 = vmatprep.subr.bf16.mxu1 %v1976_v0  ;;  %1410 = vmatprep.mubr.msk.f32.mxu1 %vm1977_vm0, %v1978_v1  ;;  %v1659_v5 = vpack.c.bf16 %v31_v3, %v30_v2  ;;  %v1662_v7 = vpack.c.bf16 %v33_v6, %v32_v4  ;;  %v34_v8 = vld [vmem:[#allocation2 + $0x160] sm:$0xff]  ;;  %v35_v9 = vld [vmem:[#allocation2 + $0x1b8] sm:$0xff]  ;;  %v36_v11 = vld [vmem:[#allocation2 + $0x210] sm:$0xff]  ;;  %s1156_s21 = sshll.u32 %s1979_s20, 4  ;;  %s1157_s21 = int_to_ptr.vmem [resolvable:$true] %s1156_s21 }
  0x16   :  { %v1665_v10 = vpack.c.bf16 %v35_v9, %v34_v8  ;;  %v37_v12 = vld [vmem:[#allocation2 + $0x268] sm:$0xff]  ;;  %v38_v14 = vld [vmem:[#allocation2 + $0x2c0] sm:$0xff]  ;;  %v39_v15 = vld [vmem:[#allocation2 + $0x318] sm:$0xff]  ;;  %s1947_s22 = scalar_lea.vmem %s1157_s21, 128  ;;  %p1952_p9 = scmp.lt.s32.totalorder %s1157_s21, %s1157_s21 }
  0x17   :  { %1660 = vmatpush3.bf16.msra.mxu0 %v1659_v5  ;;  %v1668_v13 = vpack.c.bf16 %v37_v12, %v36_v11  ;;  %v1671_v16 = vpack.c.bf16 %v39_v15, %v38_v14  ;;  %v40_v17 = vld [vmem:[#allocation2 + $0x370] sm:$0xff]  ;;  %v41_v18 = vld [vmem:[#allocation2 + $0x3c8] sm:$0xff]  ;;  %v42_v20 = vld [vmem:[#allocation2 + $0x420] sm:$0xff]  ;;  %p1948_p8 = scmp.ne.s32.totalorder %s1157_s21, %s1947_s22  ;;  %p1953_p10 = scmp.lt.s32.totalorder %s1947_s22, %s1947_s22 }
  0x18   :  { %1661 = vmatprep.subr.bf16.mxu0 %v1976_v0  ;;  %v1674_v19 = vpack.c.bf16 %v41_v18, %v40_v17  ;;  %v43_v21 = vld [vmem:[#allocation2 + $0x478] sm:$0xff]  ;;  %v44_v23 = vld [vmem:[#allocation2 + $0x4d0] sm:$0xff]  ;;  %v45_v24 = vld [vmem:[#allocation2 + $0x528] sm:$0xff] }
  0x19   :  { %v1677_v22 = vpack.c.bf16 %v43_v21, %v42_v20  ;;  %v1680_v25 = vpack.c.bf16 %v45_v24, %v44_v23  ;;  %v29_v26 = vld [vmem:[%s2233_s0] sm:$0xff]  ;;  %v147_v27 = vld [vmem:[#allocation2 + $0x8] sm:$0xff]  ;;  %v149_v36 = vld [vmem:[#allocation2 + $0xb8] sm:$0xff]  ;;  %p1954_p11 = por %p1953_p10, %p1952_p9 }
  0x1a   :  { %v148_v28 = vld [vmem:[#allocation2 + $0x60] sm:$0xff]  ;;  %v150_v37 = vld [vmem:[#allocation2 + $0x110] sm:$0xff]  ;;  %v151_v39 = vld [vmem:[#allocation2 + $0x168] sm:$0xff] }
  0x1b   :  { %1663 = vmatpush3.bf16.msra.mxu0 %v1662_v7  ;;  %v1683_v29 = vpack.c.bf16 %v148_v28, %v147_v27  ;;  %v1165_v30 = vld [vmem:[%s2235_s2] ss:$0 sm:$0xff]  ;;  %v1686_v38 = vpack.c.bf16 %v150_v37, %v149_v36  ;;  %v153_v42 = vld [vmem:[#allocation2 + $0x218] sm:$0xff]  ;;  %v154_v43 = vld [vmem:[#allocation2 + $0x270] sm:$0xff]  ;;  %p1955_p12 = pnand %p1954_p11, %p1948_p8 }
  0x1c   :  { %1664 = vmatprep.subr.bf16.mxu0 %v1976_v0  ;;  %v152_v40 = vld [vmem:[#allocation2 + $0x1c0] sm:$0xff]  ;;  %v1692_v44 = vpack.c.bf16 %v154_v43, %v153_v42  ;;  %v155_v45 = vld [vmem:[#allocation2 + $0x2c8] sm:$0xff]  ;;  %v157_v48 = vld [vmem:[#allocation2 + $0x378] sm:$0xff] }
  0x1d   :  { %1684 = vmatpush3.bf16.msra.mxu1 %v1683_v29  ;;  %v1689_v41 = vpack.c.bf16 %v152_v40, %v151_v39  ;;  %v156_v46 = vld [vmem:[#allocation2 + $0x320] sm:$0xff]  ;;  %v158_v49 = vld [vmem:[#allocation2 + $0x3d0] sm:$0xff]  ;;  %v159_v51 = vld [vmem:[#allocation2 + $0x428] sm:$0xff] }
  0x1e   :  { %1685 = vmatprep.subr.bf16.mxu1 %v1976_v0  ;;  %v1695_v47 = vpack.c.bf16 %v156_v46, %v155_v45  ;;  %v1698_v50 = vpack.c.bf16 %v158_v49, %v157_v48  ;;  %v160_v52 = vld [vmem:[#allocation2 + $0x480] sm:$0xff]  ;;  %v161_v54 = vld [vmem:[#allocation2 + $0x4d8] sm:$0xff]  ;;  %v162_v55 = vld [vmem:[#allocation2 + $0x530] sm:$0xff] }
  0x1f   :  { %1666 = vmatpush3.bf16.msra.mxu0 %v1665_v10  ;;  %v1701_v53 = vpack.c.bf16 %v160_v52, %v159_v51  ;;  %v1704_v56 = vpack.c.bf16 %v162_v55, %v161_v54  ;;  %v1166_v4 = vld [vmem:[%s2235_s2 + $0x1] ss:$0 sm:$0xff]  ;;  %v1167_v6 = vld [vmem:[%s2235_s2 + $0x2] ss:$0 sm:$0xff]  ;;  %v264_v9 = vld [vmem:[#allocation2 + $0x10] sm:$0xff] }
  0x20   :  { %1667 = vmatprep.subr.bf16.mxu0 %v1976_v0  ;;  %v265_v10 = vld [vmem:[#allocation2 + $0x68] sm:$0xff]  ;;  %v1168_v12 = vld [vmem:[%s2235_s2 + $0x3] ss:$0 sm:$0xff]  ;;  %v268_v21 = vld [vmem:[#allocation2 + $0x170] sm:$0xff] }
  0x21   :  { %1687 = vmatpush3.bf16.msra.mxu1 %v1686_v38  ;;  %v1707_v11 = vpack.c.bf16 %v265_v10, %v264_v9  ;;  %v266_v18 = vld [vmem:[#allocation2 + $0xc0] sm:$0xff]  ;;  %v272_v27 = vld [vmem:[#allocation2 + $0x2d0] sm:$0xff]  ;;  %v273_v28 = vld [vmem:[#allocation2 + $0x328] sm:$0xff] }
  0x22   :  { %1688 = vmatprep.subr.bf16.mxu1 %v1976_v0  ;;  %v270_v24 = vld [vmem:[#allocation2 + $0x220] sm:$0xff]  ;;  %v1719_v29 = vpack.c.bf16 %v273_v28, %v272_v27  ;;  %v279_v37 = vld [vmem:[#allocation2 + $0x538] sm:$0xff]  ;;  %v284_v54 = vld [vmem:[#allocation2 + $0x70] sm:$0xff] }
  0x23   :  { %1669 = vmatpush3.bf16.msra.mxu0 %v1668_v13  ;;  %v278_v36 = vld [vmem:[#allocation2 + $0x4e0] sm:$0xff]  ;;  %v285_v55 = vld [vmem:[#allocation2 + $0xc8] sm:$0xff]  ;;  %v291_v9 = vld [vmem:[#allocation2 + $0x2d8] sm:$0xff] }
  0x24   :  { %1670 = vmatprep.subr.bf16.mxu0 %v1976_v0  ;;  %v1728_v38 = vpack.c.bf16 %v279_v37, %v278_v36  ;;  %v1169_v48 = vld [vmem:[%s2235_s2 + $0x4] ss:$0 sm:$0xff]  ;;  %v292_v10 = vld [vmem:[#allocation2 + $0x330] sm:$0xff]  ;;  %v479_v28 = vld [vmem:[#allocation2 + $0x1d8] sm:$0xff] }
  0x25   :  { %1690 = vmatpush3.bf16.msra.mxu1 %v1689_v41  ;;  %v478_v27 = vld [vmem:[#allocation2 + $0x180] sm:$0xff]  ;;  %v484_v36 = vld [vmem:[#allocation2 + $0x390] sm:$0xff]  ;;  %v485_v37 = vld [vmem:[#allocation2 + $0x3e8] sm:$0xff] }
  0x26   :  { %1691 = vmatprep.subr.bf16.mxu1 %v1976_v0 }
  0x27   :  { %1672 = vmatpush3.bf16.msra.mxu0 %v1671_v16 }
  0x28   :  { %1673 = vmatprep.subr.bf16.mxu0 %v1976_v0 }
  0x29   :  { %1693 = vmatpush3.bf16.msra.mxu1 %v1692_v44 }
  0x2a   :  { %1694 = vmatprep.subr.bf16.mxu1 %v1976_v0 }
  0x2b   :  { %1675 = vmatpush3.bf16.msra.mxu0 %v1674_v19  ;;  %v267_v19 = vld [vmem:[#allocation2 + $0x118] sm:$0xff] }
  0x2c   :  { %1676 = vmatprep.subr.bf16.mxu0 %v1976_v0  ;;  %v1710_v20 = vpack.c.bf16 %v267_v19, %v266_v18  ;;  %v297_v18 = vld [vmem:[#allocation2 + $0x4e8] sm:$0xff]  ;;  %v298_v19 = vld [vmem:[#allocation2 + $0x540] sm:$0xff] }
  0x2d   :  { %1696 = vmatpush3.bf16.msra.mxu1 %v1695_v47 }
  0x2e   :  { %1697 = vmatprep.subr.bf16.mxu1 %v1976_v0 }
  0x2f   :  { %1678 = vmatpush3.bf16.msra.mxu0 %v1677_v22  ;;  %v269_v22 = vld [vmem:[#allocation2 + $0x1c8] sm:$0xff] }
  0x30   :  { %1679 = vmatprep.subr.bf16.mxu0 %v1976_v0  ;;  %v1713_v23 = vpack.c.bf16 %v269_v22, %v268_v21  ;;  %v474_v21 = vld [vmem:[#allocation2 + $0x20] sm:$0xff]  ;;  %v475_v22 = vld [vmem:[#allocation2 + $0x78] sm:$0xff] }
  0x31   :  { %1699 = vmatpush3.bf16.msra.mxu1 %v1698_v50  ;;  %v1170_v50 = vld [vmem:[%s2235_s2 + $0x5] ss:$0 sm:$0xff] }
  0x32   :  { %1700 = vmatprep.subr.bf16.mxu1 %v1976_v0 }
  0x33   :  { %1681 = vmatpush3.bf16.msra.mxu0 %v1680_v25  ;;  %v271_v25 = vld [vmem:[#allocation2 + $0x278] sm:$0xff] }
  0x34   :  { %1706 = vmatprep.subr.bf16.mxu0 %v1976_v0 }
  0x35   :  { %1702 = vmatpush3.bf16.msra.mxu1 %v1701_v53  ;;  %v283_v53 = vld [vmem:[#allocation2 + $0x18] sm:$0xff] }
  0x36   :  { %1376 = vmatmul.mubr.f32.vlgmr.msra.gmra.mrb[0].mxu0 %v29_v26  ;;  %1703 = vmatprep.subr.bf16.mxu1 %v1976_v0  ;;  %v1716_v26 = vpack.c.bf16 %v271_v25, %v270_v24  ;;  %v1755_v24 = vpack.c.bf16 %v475_v22, %v474_v21  ;;  %v477_v25 = vld [vmem:[#allocation2 + $0x128] sm:$0xff]  ;;  %v502_v22 = vld [vmem:[#allocation2 + $0x340] sm:$0xff] }
  0x37   :  { %1445 = vmatprep.mubr.msk.f32.mxu0 %vm1977_vm0, %v1978_v1  ;;  %1708 = vmatpush3.bf16.msra.mxu0 %v1707_v11  ;;  %v1743_v11 = vpack.c.bf16 %v292_v10, %v291_v9  ;;  %v501_v21 = vld [vmem:[#allocation2 + $0x2e8] sm:$0xff] }
  0x38   :  { %1709 = vmatprep.subr.bf16.mxu0 %v1976_v0 }
  0x39   :  { %1705 = vmatpush3.bf16.msra.mxu1 %v1704_v56  ;;  %v1731_v56 = vpack.c.bf16 %v284_v54, %v283_v53  ;;  %v486_v54 = vld [vmem:[#allocation2 + $0x440] sm:$0xff] }
  0x3a   :  { %1730 = vmatprep.subr.bf16.mxu1 %v1976_v0 }
  0x3b   :  { %1711 = vmatpush3.bf16.msra.mxu0 %v1710_v20  ;;  %v1752_v20 = vpack.c.bf16 %v298_v19, %v297_v18  ;;  %v499_v18 = vld [vmem:[#allocation2 + $0x238] sm:$0xff]  ;;  %v500_v19 = vld [vmem:[#allocation2 + $0x290] sm:$0xff] }
  0x3c   :  { %1712 = vmatprep.subr.bf16.mxu0 %v1976_v0 }
  0x3f   :  { %1714 = vmatpush3.bf16.msra.mxu0 %v1713_v23  ;;  %v476_v23 = vld [vmem:[#allocation2 + $0xd0] sm:$0xff] }
  0x40   :  { %1715 = vmatprep.subr.bf16.mxu0 %v1976_v0 }
  0x43   :  { %1717 = vmatpush3.bf16.msra.mxu0 %v1716_v26  ;;  %v1758_v26 = vpack.c.bf16 %v477_v25, %v476_v23  ;;  %v1791_v23 = vpack.c.bf16 %v502_v22, %v501_v21  ;;  %v504_v25 = vld [vmem:[#allocation2 + $0x3f0] sm:$0xff]  ;;  %v1176_v22 = vld [vmem:[%s2235_s2 + $0xb] ss:$0 sm:$0xff] }
  0x44   :  { %1718 = vmatprep.subr.bf16.mxu0 %v1976_v0 }
  0x47   :  { %1720 = vmatpush3.bf16.msra.mxu0 %v1719_v29  ;;  %v1761_v29 = vpack.c.bf16 %v479_v28, %v478_v27  ;;  %v505_v27 = vld [vmem:[#allocation2 + $0x448] sm:$0xff]  ;;  %v506_v28 = vld [vmem:[#allocation2 + $0x4a0] sm:$0xff] }
  0x48   :  { %1721 = vmatprep.subr.bf16.mxu0 %v1976_v0 }
 0x109   :  { %v117_v31 = vpop.f32.mrb[0].mxu0 }
 0x10a   :  { %v118_v32 = vadd.f32 %v1165_v30, %v117_v31  ;;  %v1377_v33 = vpop.f32.mrb[1].mxu0  ;;  %v274_v30 = vld [vmem:[#allocation2 + $0x380] sm:$0xff]  ;;  %v275_v31 = vld [vmem:[#allocation2 + $0x3d8] sm:$0xff] }
 0x10b   :  { %v276_v33 = vld [vmem:[#allocation2 + $0x430] sm:$0xff] }
 0x10c   :  { %v121_v34 = vmax.f32 %v118_v32, 0.0  ;;  %v1722_v32 = vpack.c.bf16 %v275_v31, %v274_v30  ;;  %v480_v30 = vld [vmem:[#allocation2 + $0x230] sm:$0xff]  ;;  %v481_v31 = vld [vmem:[#allocation2 + $0x288] sm:$0xff] }
 0x10e   :  { %124 = vadd.xlane.f32.xlu0 %v121_v34  ;;  %v127_v35 = vmul.f32 %v121_v34, %v121_v34  ;;  %1723 = vmatpush3.bf16.msra.mxu0 %v1722_v32  ;;  %v1764_v32 = vpack.c.bf16 %v481_v31, %v480_v30  ;;  %v507_v30 = vld [vmem:[#allocation2 + $0x4f8] sm:$0xff]  ;;  %v508_v31 = vld [vmem:[#allocation2 + $0x550] sm:$0xff] }
 0x10f   :  { %1724 = vmatprep.subr.bf16.mxu0 %v1976_v0 }
 0x112   :  { %128 = vadd.xlane.f32.xlu0 %v127_v35 }
 0x19b   :  { %v125_v57 = vpop.xlane.xlu0 %124 }
 0x19c   :  { %v126_v58 = vmul.f32 0.015625, %v125_v57  ;;  %v286_v57 = vld [vmem:[#allocation2 + $0x120] sm:$0xff] }
 0x19e   :  { %v131_v60 = vmul.f32 %v126_v58, %v126_v58  ;;  %v133_v2 = vsub.f32 %v121_v34, %v126_v58  ;;  %v277_v34 = vld [vmem:[#allocation2 + $0x488] sm:$0xff]  ;;  %v1734_v58 = vpack.c.bf16 %v286_v57, %v285_v55  ;;  %v487_v55 = vld [vmem:[#allocation2 + $0x498] sm:$0xff]  ;;  %v488_v57 = vld [vmem:[#allocation2 + $0x4f0] sm:$0xff] }
 0x19f   :  { %v129_v59 = vpop.xlane.xlu0 %128  ;;  %v1725_v35 = vpack.c.bf16 %v277_v34, %v276_v33  ;;  %v482_v33 = vld [vmem:[#allocation2 + $0x2e0] sm:$0xff]  ;;  %v483_v34 = vld [vmem:[#allocation2 + $0x338] sm:$0xff] }
 0x1a0   :  { %v130_v61 = vmul.f32 0.015625, %v129_v59  ;;  %v1171_v59 = vld [vmem:[%s2235_s2 + $0x6] ss:$0 sm:$0xff] }
 0x1a1   :  { %1726 = vmatpush3.bf16.msra.mxu0 %v1725_v35  ;;  %v1767_v35 = vpack.c.bf16 %v483_v34, %v482_v33  ;;  %v685_v33 = vld [vmem:[#allocation2 + $0x38] sm:$0xff]  ;;  %v687_v34 = vld [vmem:[#allocation2 + $0x90] sm:$0xff] }
 0x1a2   :  { %v132_v62 = vsub.f32 %v130_v61, %v131_v60  ;;  %1727 = vmatprep.subr.bf16.mxu0 %v1976_v0 }
 0x1a4   :  { %v134_v63 = vadd.f32 1e-05, %v132_v62 }
 0x1a5   :  { %1729 = vmatpush3.bf16.msra.mxu0 %v1728_v38  ;;  %v1770_v38 = vpack.c.bf16 %v485_v37, %v484_v36  ;;  %v1802_v36 = vpack.c.bf16 %v687_v34, %v685_v33  ;;  %v686_v37 = vld [vmem:[#allocation2 + $0x88] sm:$0xff]  ;;  %v714_v33 = vld [vmem:[#allocation2 + $0x558] sm:$0xff] }
 0x1a6   :  { %1913 = vrsqrt.f32 %v134_v63  ;;  %1754 = vmatprep.subr.bf16.mxu0 %v1976_v0 }
 0x1b0   :  { %v1914_v3 = vpop.eup %1913 }
 0x1b1   :  { %v136_v5 = vmul.f32 %v1914_v3, %v133_v2  ;;  %v287_v3 = vld [vmem:[#allocation2 + $0x178] sm:$0xff] }
 0x1b3   :  { %v141_v7 = vmul.f32 %v1166_v4, %v136_v5  ;;  %v288_v4 = vld [vmem:[#allocation2 + $0x1d0] sm:$0xff] }
 0x1b4   :  { %v1737_v5 = vpack.c.bf16 %v288_v4, %v287_v3  ;;  %v493_v4 = vld [vmem:[#allocation2 + $0x28] sm:$0xff] }
 0x1b5   :  { %v146_v8 = vadd.f32 %v1167_v6, %v141_v7  ;;  %v289_v6 = vld [vmem:[#allocation2 + $0x228] sm:$0xff]  ;;  %v290_v7 = vld [vmem:[#allocation2 + $0x280] sm:$0xff] }
 0x1b7   :  { %1411 = vmatmul.mubr.f32.vlgmr.msra.gmra.mrb[0].mxu1 %v146_v8  ;;  %v1740_v8 = vpack.c.bf16 %v290_v7, %v289_v6  ;;  %v495_v6 = vld [vmem:[#allocation2 + $0xd8] sm:$0xff] }
 0x1b8   :  { %1480 = vmatprep.mubr.msk.f32.mxu1 %vm1977_vm0, %v1978_v1  ;;  %1732 = vmatpush3.bf16.msra.mxu1 %v1731_v56  ;;  %v1773_v56 = vpack.c.bf16 %v487_v55, %v486_v54  ;;  %v696_v55 = vld [vmem:[#allocation2 + $0x240] sm:$0xff] }
 0x1b9   :  { %1733 = vmatprep.subr.bf16.mxu1 %v1976_v0 }
 0x1bc   :  { %1735 = vmatpush3.bf16.msra.mxu1 %v1734_v58  ;;  %v489_v58 = vld [vmem:[#allocation2 + $0x548] sm:$0xff] }
 0x1bd   :  { %1736 = vmatprep.subr.bf16.mxu1 %v1976_v0 }
 0x1c0   :  { %1738 = vmatpush3.bf16.msra.mxu1 %v1737_v5  ;;  %v494_v5 = vld [vmem:[#allocation2 + $0x80] sm:$0xff] }
 0x1c1   :  { %1739 = vmatprep.subr.bf16.mxu1 %v1976_v0  ;;  %v1779_v7 = vpack.c.bf16 %v494_v5, %v493_v4  ;;  %v707_v4 = vld [vmem:[#allocation2 + $0x400] sm:$0xff] }
 0x1c4   :  { %1741 = vmatpush3.bf16.msra.mxu1 %v1740_v8  ;;  %v496_v8 = vld [vmem:[#allocation2 + $0x130] sm:$0xff] }
 0x1c5   :  { %1742 = vmatprep.subr.bf16.mxu1 %v1976_v0  ;;  %v1782_v9 = vpack.c.bf16 %v496_v8, %v495_v6  ;;  %v706_v8 = vld [vmem:[#allocation2 + $0x3f8] sm:$0xff] }
 0x1c8   :  { %1744 = vmatpush3.bf16.msra.mxu1 %v1743_v11 }
 0x1c9   :  { %1745 = vmatprep.subr.bf16.mxu1 %v1976_v0 }
 0x28a   :  { %v234_v13 = vpop.f32.mrb[0].mxu1 }
 0x28b   :  { %v235_v14 = vadd.f32 %v1168_v12, %v234_v13  ;;  %v1412_v15 = vpop.f32.mrb[1].mxu1  ;;  %v293_v12 = vld [vmem:[#allocation2 + $0x388] sm:$0xff]  ;;  %v294_v13 = vld [vmem:[#allocation2 + $0x3e0] sm:$0xff] }
 0x28c   :  { %v295_v15 = vld [vmem:[#allocation2 + $0x438] sm:$0xff] }
 0x28d   :  { %v238_v16 = vmax.f32 %v235_v14, 0.0  ;;  %v1746_v14 = vpack.c.bf16 %v294_v13, %v293_v12 }
 0x28f   :  { %241 = vadd.xlane.f32.xlu1 %v238_v16  ;;  %v244_v17 = vmul.f32 %v238_v16, %v238_v16  ;;  %1747 = vmatpush3.bf16.msra.mxu1 %v1746_v14 }
 0x290   :  { %1748 = vmatprep.subr.bf16.mxu1 %v1976_v0 }
 0x293   :  { %245 = vadd.xlane.f32.xlu1 %v244_v17 }
 0x31c   :  { %v242_v39 = vpop.xlane.xlu1 %241 }
 0x31d   :  { %v243_v40 = vmul.f32 0.03125, %v242_v39 }
 0x31f   :  { %v248_v42 = vmul.f32 %v243_v40, %v243_v40  ;;  %v250_v46 = vsub.f32 %v238_v16, %v243_v40  ;;  %v296_v16 = vld [vmem:[#allocation2 + $0x490] sm:$0xff] }
 0x320   :  { %v246_v41 = vpop.xlane.xlu1 %245  ;;  %v1749_v17 = vpack.c.bf16 %v296_v16, %v295_v15  ;;  %v497_v15 = vld [vmem:[#allocation2 + $0x188] sm:$0xff]  ;;  %v498_v16 = vld [vmem:[#allocation2 + $0x1e0] sm:$0xff] }
 0x321   :  { %v247_v43 = vmul.f32 0.03125, %v246_v41 }
 0x322   :  { %1750 = vmatpush3.bf16.msra.mxu1 %v1749_v17  ;;  %v1785_v17 = vpack.c.bf16 %v498_v16, %v497_v15 }
 0x323   :  { %v249_v44 = vsub.f32 %v247_v43, %v248_v42  ;;  %1751 = vmatprep.subr.bf16.mxu1 %v1976_v0 }
 0x325   :  { %v251_v45 = vadd.f32 1e-05, %v249_v44 }
 0x326   :  { %1753 = vmatpush3.bf16.msra.mxu1 %v1752_v20  ;;  %v1788_v20 = vpack.c.bf16 %v500_v19, %v499_v18 }
 0x327   :  { %1915 = vrsqrt.f32 %v251_v45  ;;  %1778 = vmatprep.subr.bf16.mxu1 %v1976_v0 }
 0x331   :  { %v1916_v47 = vpop.eup %1915 }
 0x332   :  { %v253_v49 = vmul.f32 %v1916_v47, %v250_v46 }
 0x334   :  { %v258_v51 = vmul.f32 %v1169_v48, %v253_v49  ;;  %v1172_v48 = vld [vmem:[%s2235_s2 + $0x7] ss:$0 sm:$0xff] }
 0x336   :  { %v2067_v52 = vadd.f32 %v1170_v50, %v258_v51  ;;  %v1173_v50 = vld [vmem:[%s2235_s2 + $0x8] ss:$0 sm:$0xff] }
 0x338   :  { %1446 = vmatmul.mubr.f32.vlgmr.msra.gmra.mrb[2].mxu0 %v2067_v52 }
 0x339   :  { %1515 = vmatprep.mubr.msk.f32.mxu0 %vm1977_vm0, %v1978_v1  ;;  %1756 = vmatpush3.bf16.msra.mxu0 %v1755_v24  ;;  %v503_v24 = vld [vmem:[#allocation2 + $0x398] sm:$0xff] }
 0x33a   :  { %1757 = vmatprep.subr.bf16.mxu0 %v1976_v0 }
 0x33d   :  { %1759 = vmatpush3.bf16.msra.mxu0 %v1758_v26  ;;  %v1794_v26 = vpack.c.bf16 %v504_v25, %v503_v24  ;;  %v1177_v24 = vld [vmem:[%s2235_s2 + $0xc] ss:$0 sm:$0xff] }
 0x33e   :  { %1760 = vmatprep.subr.bf16.mxu0 %v1976_v0 }
 0x341   :  { %1762 = vmatpush3.bf16.msra.mxu0 %v1761_v29  ;;  %v1797_v29 = vpack.c.bf16 %v506_v28, %v505_v27  ;;  %v708_v27 = vld [vmem:[#allocation2 + $0x450] sm:$0xff]  ;;  %v710_v28 = vld [vmem:[#allocation2 + $0x4a8] sm:$0xff] }
 0x342   :  { %1763 = vmatprep.subr.bf16.mxu0 %v1976_v0 }
 0x345   :  { %1765 = vmatpush3.bf16.msra.mxu0 %v1764_v32  ;;  %v1800_v32 = vpack.c.bf16 %v508_v31, %v507_v30  ;;  %v715_v30 = vld [vmem:[#allocation2 + $0x560] sm:$0xff] }
 0x346   :  { %1766 = vmatprep.subr.bf16.mxu0 %v1976_v0 }
 0x349   :  { %1768 = vmatpush3.bf16.msra.mxu0 %v1767_v35  ;;  %v684_v35 = vld [vmem:[#allocation2 + $0x30] sm:$0xff] }
 0x34a   :  { %1769 = vmatprep.subr.bf16.mxu0 %v1976_v0 }
 0x34d   :  { %1771 = vmatpush3.bf16.msra.mxu0 %v1770_v38  ;;  %v689_v38 = vld [vmem:[#allocation2 + $0xe8] sm:$0xff] }
 0x34e   :  { %1772 = vmatprep.subr.bf16.mxu0 %v1976_v0 }
 0x351   :  { %1774 = vmatpush3.bf16.msra.mxu0 %v1773_v56  ;;  %v698_v56 = vld [vmem:[#allocation2 + $0x298] sm:$0xff] }
 0x352   :  { %1775 = vmatprep.subr.bf16.mxu0 %v1976_v0 }
 0x40b   :  { %v370_v60 = vpop.f32.mrb[2].mxu0 }
 0x40c   :  { %v371_v61 = vadd.f32 %v1171_v59, %v370_v60  ;;  %v1447_v62 = vpop.f32.mrb[3].mxu0  ;;  %v1776_v59 = vpack.c.bf16 %v489_v58, %v488_v57  ;;  %v1174_v60 = vld [vmem:[%s2235_s2 + $0x9] ss:$0 sm:$0xff]  ;;  %v701_v57 = vld [vmem:[#allocation2 + $0x2f8] sm:$0xff]  ;;  %v703_v58 = vld [vmem:[#allocation2 + $0x350] sm:$0xff] }
 0x40e   :  { %v2077_v63 = vmax.f32 %v371_v61, 0.0  ;;  %1777 = vmatpush3.bf16.msra.mxu0 %v1776_v59  ;;  %v1816_v59 = vpack.c.bf16 %v698_v56, %v696_v55 }
 0x40f   :  { %1803 = vmatprep.subr.bf16.mxu0 %v1802_v36 }
 0x410   :  { %375 = vadd.xlane.f32.xlu0 %v2077_v63  ;;  %v378_v2 = vmul.f32 %v2077_v63, %v2077_v63 }
 0x412   :  { %379 = vadd.xlane.f32.xlu1 %v378_v2 }
 0x49d   :  { %v376_v39 = vpop.xlane.xlu0 %375 }
 0x49e   :  { %v377_v40 = vmul.f32 0.03125, %v376_v39  ;;  %v691_v39 = vld [vmem:[#allocation2 + $0x140] sm:$0xff] }
 0x49f   :  { %v380_v41 = vpop.xlane.xlu1 %379 }
 0x4a0   :  { %v382_v42 = vmul.f32 %v377_v40, %v377_v40  ;;  %v381_v43 = vmul.f32 0.03125, %v380_v41  ;;  %v384_v46 = vsub.f32 %v2077_v63, %v377_v40  ;;  %v1804_v40 = vpack.c.bf16 %v686_v37, %v684_v35  ;;  %v1178_v35 = vld [vmem:[%s2235_s2 + $0xd] ss:$0 sm:$0xff] }
 0x4a1   :  { %v1806_v41 = vpack.c.bf16 %v691_v39, %v689_v38 }
 0x4a2   :  { %v383_v44 = vsub.f32 %v381_v43, %v382_v42  ;;  %v688_v42 = vld [vmem:[#allocation2 + $0xe0] sm:$0xff]  ;;  %v690_v43 = vld [vmem:[#allocation2 + $0x138] sm:$0xff] }
 0x4a4   :  { %v385_v45 = vadd.f32 1e-05, %v383_v44  ;;  %v693_v44 = vld [vmem:[#allocation2 + $0x198] sm:$0xff] }
 0x4a6   :  { %1917 = vrsqrt.f32 %v385_v45  ;;  %v695_v45 = vld [vmem:[#allocation2 + $0x1f0] sm:$0xff] }
 0x4b0   :  { %v1918_v47 = vpop.eup %1917 }
 0x4b1   :  { %v387_v49 = vmul.f32 %v1918_v47, %v384_v46  ;;  %v1808_v46 = vpack.c.bf16 %v690_v43, %v688_v42  ;;  %v1810_v47 = vpack.c.bf16 %v695_v45, %v693_v44  ;;  %v946_v42 = vld [vmem:[#allocation2 + $0xa0] sm:$0xff]  ;;  %v852_v45 = vld [vmem:[#allocation2 + $0x98] sm:$0xff] }
 0x4b2   :  { %v851_v43 = vld [vmem:[#allocation2 + $0x40] sm:$0xff] }
 0x4b3   :  { %v392_v51 = vmul.f32 %v1172_v48, %v387_v49  ;;  %v692_v48 = vld [vmem:[#allocation2 + $0x190] sm:$0xff]  ;;  %v694_v49 = vld [vmem:[#allocation2 + $0x1e8] sm:$0xff] }
 0x4b5   :  { %v397_v53 = vadd.f32 %v1173_v50, %v392_v51  ;;  %v697_v50 = vld [vmem:[#allocation2 + $0x248] sm:$0xff]  ;;  %v699_v51 = vld [vmem:[#allocation2 + $0x2a0] sm:$0xff] }
 0x4b6   :  { %v1814_v54 = vpack.c.bf16 %v699_v51, %v697_v50 }
 0x4b7   :  { %1481 = vmatmul.mubr.f32.vlgmr.msra.gmra.mrb[2].mxu1 %v397_v53  ;;  %v1812_v53 = vpack.c.bf16 %v694_v49, %v692_v48  ;;  %v1835_v48 = vpack.c.bf16 %v852_v45, %v851_v43 }
 0x4b8   :  { %1550 = vmatprep.mubr.msk.f32.mxu1 %vm1977_vm0, %v1978_v1  ;;  %1780 = vmatpush3.bf16.msra.mxu1 %v1779_v7  ;;  %v704_v7 = vld [vmem:[#allocation2 + $0x3a0] sm:$0xff] }
 0x4b9   :  { %1781 = vmatprep.subr.bf16.mxu1 %v1976_v0 }
 0x4bc   :  { %1783 = vmatpush3.bf16.msra.mxu1 %v1782_v9  ;;  %v709_v9 = vld [vmem:[#allocation2 + $0x458] sm:$0xff] }
 0x4bd   :  { %1784 = vmatprep.subr.bf16.mxu1 %v1976_v0 }
 0x4c0   :  { %1786 = vmatpush3.bf16.msra.mxu1 %v1785_v17 }
 0x4c1   :  { %1787 = vmatprep.subr.bf16.mxu1 %v1976_v0 }
 0x4c4   :  { %1789 = vmatpush3.bf16.msra.mxu1 %v1788_v20 }
 0x4c5   :  { %1790 = vmatprep.subr.bf16.mxu1 %v1976_v0 }
 0x4c8   :  { %1792 = vmatpush3.bf16.msra.mxu1 %v1791_v23 }
 0x4c9   :  { %1793 = vmatprep.subr.bf16.mxu1 %v1976_v0 }
 0x4cc   :  { %1795 = vmatpush3.bf16.msra.mxu1 %v1794_v26 }
 0x4cd   :  { %1796 = vmatprep.subr.bf16.mxu1 %v1976_v0 }
 0x4d0   :  { %1798 = vmatpush3.bf16.msra.mxu1 %v1797_v29  ;;  %v1828_v29 = vpack.c.bf16 %v710_v28, %v708_v27 }
 0x4d1   :  { %1799 = vmatprep.subr.bf16.mxu1 %v1976_v0 }
 0x4d4   :  { %1801 = vmatpush3.bf16.msra.mxu1 %v1800_v32  ;;  %v712_v32 = vld [vmem:[#allocation2 + $0x500] sm:$0xff] }
 0x4d5   :  { %1834 = vmatprep.subr.bf16.mxu1 %v1976_v0  ;;  %v1832_v34 = vpack.c.bf16 %v714_v33, %v712_v32 }
 0x58a   :  { %v468_v61 = vpop.f32.mrb[2].mxu1 }
 0x58b   :  { %v469_v62 = vadd.f32 %v1174_v60, %v468_v61  ;;  %v1482_v63 = vpop.f32.mrb[3].mxu1  ;;  %v1818_v60 = vpack.c.bf16 %v703_v58, %v701_v57  ;;  %v700_v61 = vld [vmem:[#allocation2 + $0x2f0] sm:$0xff] }
 0x58c   :  { %v705_v63 = vld [vmem:[#allocation2 + $0x3a8] sm:$0xff] }
 0x58d   :  { %v2108_v2 = vadd.f32 %v469_v62, %v2067_v52  ;;  %v1175_v52 = vld [vmem:[%s2235_s2 + $0xa] ss:$0 sm:$0xff]  ;;  %v1822_v6 = vpack.c.bf16 %v707_v4, %v705_v63  ;;  %v950_v63 = vld [vmem:[#allocation2 + $0x200] sm:$0xff] }
 0x58e   :  { %v702_v62 = vld [vmem:[#allocation2 + $0x348] sm:$0xff] }
 0x58f   :  { %v473_v3 = vmax.f32 %v2108_v2, 0.0  ;;  %v1820_v5 = vpack.c.bf16 %v702_v62, %v700_v61  ;;  %v1179_v2 = vld [vmem:[%s2235_s2 + $0xe] ss:$0 sm:$0xff] }
 0x590   :  { %v949_v61 = vld [vmem:[#allocation2 + $0x1a8] sm:$0xff] }
 0x591   :  { %1516 = vmatmul.mubr.f32.vlgmr.msra.gmra.mrb[4].mxu0 %v473_v3  ;;  %v1865_v4 = vpack.c.bf16 %v950_v63, %v949_v61  ;;  %v1181_v61 = vld [vmem:[%s2235_s2 + $0xf] ss:$0 sm:$0xff]  ;;  %v1047_v63 = vld [vmem:[#allocation2 + $0x50] sm:$0xff] }
 0x592   :  { %780 = vmatprep.mubr.f32.mxu0 %v1978_v1  ;;  %1805 = vmatpush1.bf16.msra.mxu0 %v1804_v40 }
 0x593   :  { %1807 = vmatprep.subr.bf16.mxu0 %v1806_v41  ;;  %v945_v41 = vld [vmem:[#allocation2 + $0x48] sm:$0xff] }
 0x594   :  { %v1859_v44 = vpack.c.bf16 %v946_v42, %v945_v41 }
 0x596   :  { %1809 = vmatpush1.bf16.msra.mxu0 %v1808_v46  ;;  %v947_v46 = vld [vmem:[#allocation2 + $0xf8] sm:$0xff] }
 0x597   :  { %1811 = vmatprep.subr.bf16.mxu0 %v1810_v47  ;;  %v948_v47 = vld [vmem:[#allocation2 + $0x150] sm:$0xff] }
 0x598   :  { %v1862_v49 = vpack.c.bf16 %v948_v47, %v947_v46 }
 0x59a   :  { %1813 = vmatpush1.bf16.msra.mxu0 %v1812_v53 }
 0x59b   :  { %1815 = vmatprep.subr.bf16.mxu0 %v1814_v54 }
 0x59e   :  { %1817 = vmatpush1.bf16.msra.mxu0 %v1816_v59  ;;  %v853_v59 = vld [vmem:[#allocation2 + $0xf0] sm:$0xff] }
 0x59f   :  { %1819 = vmatprep.subr.bf16.mxu0 %v1818_v60  ;;  %v854_v60 = vld [vmem:[#allocation2 + $0x148] sm:$0xff] }
 0x5a0   :  { %v1838_v62 = vpack.c.bf16 %v854_v60, %v853_v59 }
 0x5a2   :  { %1821 = vmatpush1.bf16.msra.mxu0 %v1820_v5  ;;  %v855_v5 = vld [vmem:[#allocation2 + $0x1a0] sm:$0xff] }
 0x5a3   :  { %1823 = vmatprep.subr.bf16.mxu0 %v1822_v6  ;;  %v856_v6 = vld [vmem:[#allocation2 + $0x1f8] sm:$0xff] }
 0x664   :  { %v580_v10 = vpop.f32.mrb[4].mxu0 }
 0x665   :  { %v581_v11 = vadd.f32 %v1175_v52, %v580_v10  ;;  %v1517_v12 = vpop.f32.mrb[5].mxu0  ;;  %v711_v52 = vld [vmem:[#allocation2 + $0x4b0] sm:$0xff]  ;;  %v1824_v10 = vpack.c.bf16 %v706_v8, %v704_v7  ;;  %v951_v7 = vld [vmem:[#allocation2 + $0x258] sm:$0xff]  ;;  %v1841_v8 = vpack.c.bf16 %v856_v6, %v855_v5 }
 0x666   :  { %v1182_v5 = vld [vmem:[%s2235_s2 + $0x10] ss:$0 sm:$0xff] }
 0x667   :  { %v2119_v13 = vmax.f32 %v581_v11, 0.0  ;;  %v1826_v11 = vpack.c.bf16 %v711_v52, %v709_v9  ;;  %1825 = vmatpush1.bf16.msra.mxu0 %v1824_v10  ;;  %v952_v9 = vld [vmem:[#allocation2 + $0x2b0] sm:$0xff] }
 0x668   :  { %v1868_v52 = vpack.c.bf16 %v952_v9, %v951_v7  ;;  %v857_v10 = vld [vmem:[#allocation2 + $0x250] sm:$0xff]  ;;  %v1049_v9 = vld [vmem:[#allocation2 + $0x100] sm:$0xff] }
 0x669   :  { %585 = vadd.xlane.f32.xlu0 %v2119_v13  ;;  %v588_v14 = vmul.f32 %v2119_v13, %v2119_v13  ;;  %1827 = vmatprep.subr.bf16.mxu0 %v1826_v11  ;;  %v858_v11 = vld [vmem:[#allocation2 + $0x2a8] sm:$0xff] }
 0x66b   :  { %589 = vadd.xlane.f32.xlu1 %v588_v14  ;;  %1829 = vmatpush1.bf16.msra.mxu0 %v1828_v29  ;;  %v863_v29 = vld [vmem:[#allocation2 + $0x460] sm:$0xff] }
 0x6f6   :  { %v586_v12 = vpop.xlane.xlu0 %585 }
 0x6f7   :  { %v587_v14 = vmul.f32 0.03125, %v586_v12  ;;  %v953_v12 = vld [vmem:[#allocation2 + $0x308] sm:$0xff] }
 0x6f8   :  { %v590_v15 = vpop.xlane.xlu1 %589 }
 0x6f9   :  { %v592_v16 = vmul.f32 %v587_v14, %v587_v14  ;;  %v591_v17 = vmul.f32 0.03125, %v590_v15  ;;  %v594_v20 = vsub.f32 %v2119_v13, %v587_v14  ;;  %v713_v13 = vld [vmem:[#allocation2 + $0x508] sm:$0xff]  ;;  %v1844_v14 = vpack.c.bf16 %v858_v11, %v857_v10  ;;  %v954_v15 = vld [vmem:[#allocation2 + $0x360] sm:$0xff]  ;;  %v1051_v10 = vld [vmem:[#allocation2 + $0x1b0] sm:$0xff] }
 0x6fa   :  { %v1830_v31 = vpack.c.bf16 %v715_v30, %v713_v13  ;;  %v864_v13 = vld [vmem:[#allocation2 + $0x4b8] sm:$0xff]  ;;  %v1052_v11 = vld [vmem:[#allocation2 + $0x208] sm:$0xff] }
 0x6fb   :  { %v593_v18 = vsub.f32 %v591_v17, %v592_v16  ;;  %v1871_v16 = vpack.c.bf16 %v954_v15, %v953_v12  ;;  %v859_v17 = vld [vmem:[#allocation2 + $0x300] sm:$0xff]  ;;  %v959_v30 = vld [vmem:[#allocation2 + $0x518] sm:$0xff]  ;;  %v1853_v32 = vpack.c.bf16 %v864_v13, %v863_v29  ;;  %v1889_v12 = vpack.c.bf16 %v1052_v11, %v1051_v10  ;;  %v1186_v29 = vld [vmem:[%s2235_s2 + $0x15] ss:$0 sm:$0xff] }
 0x6fc   :  { %1831 = vmatprep.subr.bf16.mxu0 %v1830_v31  ;;  %v960_v31 = vld [vmem:[#allocation2 + $0x570] sm:$0xff]  ;;  %v1054_v15 = vld [vmem:[#allocation2 + $0x2b8] sm:$0xff] }
 0x6fd   :  { %v595_v19 = vadd.f32 1e-05, %v593_v18  ;;  %1833 = vmatpush1.bf16.msra.mxu0 %v1832_v34  ;;  %v860_v18 = vld [vmem:[#allocation2 + $0x358] sm:$0xff]  ;;  %v1880_v33 = vpack.c.bf16 %v960_v31, %v959_v30  ;;  %v865_v34 = vld [vmem:[#allocation2 + $0x510] sm:$0xff] }
 0x6fe   :  { %1858 = vmatprep.subr.bf16.mxu0 %v1976_v0 }
 0x6ff   :  { %1919 = vrsqrt.f32 %v595_v19  ;;  %v955_v19 = vld [vmem:[#allocation2 + $0x3b8] sm:$0xff] }
 0x709   :  { %v1920_v21 = vpop.eup %1919 }
 0x70a   :  { %v597_v23 = vmul.f32 %v1920_v21, %v594_v20  ;;  %v1847_v20 = vpack.c.bf16 %v860_v18, %v859_v17  ;;  %v956_v21 = vld [vmem:[#allocation2 + $0x410] sm:$0xff]  ;;  %v1056_v18 = vld [vmem:[#allocation2 + $0x368] sm:$0xff] }
 0x70b   :  { %v1055_v17 = vld [vmem:[#allocation2 + $0x310] sm:$0xff] }
 0x70c   :  { %v602_v25 = vmul.f32 %v1176_v22, %v597_v23  ;;  %v861_v22 = vld [vmem:[#allocation2 + $0x3b0] sm:$0xff]  ;;  %v862_v23 = vld [vmem:[#allocation2 + $0x408] sm:$0xff] }
 0x70d   :  { %v1850_v27 = vpack.c.bf16 %v862_v23, %v861_v22  ;;  %v1059_v22 = vld [vmem:[#allocation2 + $0x470] sm:$0xff]  ;;  %v1060_v23 = vld [vmem:[#allocation2 + $0x4c8] sm:$0xff] }
 0x70e   :  { %v607_v26 = vadd.f32 %v1177_v24, %v602_v25  ;;  %v1874_v24 = vpack.c.bf16 %v956_v21, %v955_v19  ;;  %v957_v25 = vld [vmem:[#allocation2 + $0x468] sm:$0xff]  ;;  %v1895_v19 = vpack.c.bf16 %v1056_v18, %v1055_v17 }
 0x710   :  { %1551 = vmatmul.mubr.f32.vlgmr.msra.gmra.mrb[4].mxu1 %v607_v26  ;;  %v958_v26 = vld [vmem:[#allocation2 + $0x4c0] sm:$0xff] }
 0x711   :  { %1585 = vmatprep.mubr.msk.f32.mxu1 %vm1977_vm0, %v1978_v1  ;;  %1836 = vmatpush3.bf16.msra.mxu1 %v1835_v48  ;;  %v1877_v28 = vpack.c.bf16 %v958_v26, %v957_v25  ;;  %v1061_v25 = vld [vmem:[#allocation2 + $0x520] sm:$0xff]  ;;  %v1062_v26 = vld [vmem:[#allocation2 + $0x578] sm:$0xff] }
 0x712   :  { %1837 = vmatprep.subr.bf16.mxu1 %v1976_v0 }
 0x715   :  { %1839 = vmatpush3.bf16.msra.mxu1 %v1838_v62 }
 0x716   :  { %1840 = vmatprep.subr.bf16.mxu1 %v1976_v0 }
 0x719   :  { %1842 = vmatpush3.bf16.msra.mxu1 %v1841_v8 }
 0x71a   :  { %1843 = vmatprep.subr.bf16.mxu1 %v1976_v0 }
 0x71d   :  { %1845 = vmatpush3.bf16.msra.mxu1 %v1844_v14  ;;  %v1053_v14 = vld [vmem:[#allocation2 + $0x260] sm:$0xff] }
 0x71e   :  { %1846 = vmatprep.subr.bf16.mxu1 %v1976_v0 }
 0x721   :  { %1848 = vmatpush3.bf16.msra.mxu1 %v1847_v20  ;;  %v1058_v20 = vld [vmem:[#allocation2 + $0x418] sm:$0xff] }
 0x722   :  { %1849 = vmatprep.subr.bf16.mxu1 %v1976_v0 }
 0x725   :  { %1851 = vmatpush3.bf16.msra.mxu1 %v1850_v27  ;;  %v1904_v27 = vpack.c.bf16 %v1062_v26, %v1061_v25 }
 0x726   :  { %1852 = vmatprep.subr.bf16.mxu1 %v1976_v0 }
 0x729   :  { %1854 = vmatpush3.bf16.msra.mxu1 %v1853_v32 }
 0x72a   :  { %1855 = vmatprep.subr.bf16.mxu1 %v1976_v0 }
 0x7e3   :  { %v678_v36 = vpop.f32.mrb[4].mxu1 }
 0x7e4   :  { %v679_v37 = vadd.f32 %v1178_v35, %v678_v36  ;;  %v1552_v38 = vpop.f32.mrb[5].mxu1  ;;  %v866_v35 = vld [vmem:[#allocation2 + $0x568] sm:$0xff] }
 0x7e5   :  { %v1856_v36 = vpack.c.bf16 %v866_v35, %v865_v34 }
 0x7e6   :  { %v682_v39 = vadd.f32 %v679_v37, %v473_v3  ;;  %v1180_v3 = vld [vmem:[%s2235_s2 + $0x12] ss:$0 sm:$0xff] }
 0x7e7   :  { %1857 = vmatpush3.bf16.msra.mxu1 %v1856_v36 }
 0x7e8   :  { %v2145_v40 = vmax.f32 %v682_v39, 0.0  ;;  %1882 = vmatprep.subr.bf16.mxu1 %v1976_v0 }
 0x7ea   :  { %781 = vmatmul.mubr.f32.vlgmr.msra.gmra.mrb[6].mxu0 %v2145_v40 }
 0x7eb   :  { %1620 = vmatprep.mubr.msk.f32.mxu0 %vm1977_vm0, %v1978_v1  ;;  %1860 = vmatpush3.bf16.msra.mxu0 %v1859_v44 }
 0x7ec   :  { %1861 = vmatprep.subr.bf16.mxu0 %v1976_v0 }
 0x7ef   :  { %1863 = vmatpush3.bf16.msra.mxu0 %v1862_v49 }
 0x7f0   :  { %1864 = vmatprep.subr.bf16.mxu0 %v1976_v0 }
 0x7f3   :  { %1866 = vmatpush3.bf16.msra.mxu0 %v1865_v4  ;;  %v1048_v4 = vld [vmem:[#allocation2 + $0xa8] sm:$0xff] }
 0x7f4   :  { %1867 = vmatprep.subr.bf16.mxu0 %v1976_v0  ;;  %v1883_v7 = vpack.c.bf16 %v1048_v4, %v1047_v63 }
 0x7f7   :  { %1869 = vmatpush3.bf16.msra.mxu0 %v1868_v52 }
 0x7f8   :  { %1870 = vmatprep.subr.bf16.mxu0 %v1976_v0 }
 0x7fb   :  { %1872 = vmatpush3.bf16.msra.mxu0 %v1871_v16  ;;  %v1892_v16 = vpack.c.bf16 %v1054_v15, %v1053_v14 }
 0x7fc   :  { %1873 = vmatprep.subr.bf16.mxu0 %v1976_v0 }
 0x7ff   :  { %1875 = vmatpush3.bf16.msra.mxu0 %v1874_v24  ;;  %v1901_v24 = vpack.c.bf16 %v1060_v23, %v1059_v22 }
 0x800   :  { %1876 = vmatprep.subr.bf16.mxu0 %v1976_v0 }
 0x803   :  { %1878 = vmatpush3.bf16.msra.mxu0 %v1877_v28 }
 0x804   :  { %1879 = vmatprep.subr.bf16.mxu0 %v1976_v0 }
 0x807   :  { %1881 = vmatpush3.bf16.msra.mxu0 %v1880_v33  ;;  %v1185_v33 = vld [vmem:[%s2235_s2 + $0x11] ss:$0 sm:$0xff] }
 0x8bd   :  { %v782_v50 = vpop.f32.mrb[6].mxu0 }
 0x8be   :  { %v784_v51 = vpop.f32.mrb[7].mxu0  ;;  %v792_v53 = vadd.f32 %v1179_v2, %v782_v50 }
 0x8bf   :  { %v799_v54 = vadd.f32 %v1180_v3, %v784_v51 }
 0x8c0   :  { %v2161_v56 = vmax.f32 %v792_v53, 0.0  ;;  %v1183_v53 = vld [vmem:[%s2235_s2 + $0x13] ss:$0 sm:$0xff] }
 0x8c1   :  { %v2159_v55 = vmax.f32 %v799_v54, 0.0 }
 0x8c2   :  { %v806_v58 = vmul.f32 %v2161_v56, %v2161_v56 }
 0x8c3   :  { %828 = vadd.xlane.f32.xlu0 %v2159_v55  ;;  %v831_v57 = vmul.f32 %v2159_v55, %v2159_v55 }
 0x8c5   :  { %832 = vadd.xlane.f32.xlu1 %v831_v57  ;;  %v1184_v57 = vld [vmem:[%s2235_s2 + $0x14] ss:$0 sm:$0xff] }
 0x8c7   :  { %803 = vadd.xlane.f32.xlu0 %v2161_v56 }
 0x8c9   :  { %807 = vadd.xlane.f32.xlu1 %v806_v58 }
 0x950   :  { %v829_v37 = vpop.xlane.xlu0 %828 }
 0x951   :  { %v830_v38 = vmul.f32 0.03125, %v829_v37  ;;  %v1187_v37 = vld [vmem:[%s2235_s2 + $0x16] ss:$0 sm:$0xff] }
 0x952   :  { %v833_v39 = vpop.xlane.xlu1 %832 }
 0x953   :  { %v835_v41 = vmul.f32 %v830_v38, %v830_v38  ;;  %v834_v42 = vmul.f32 0.03125, %v833_v39  ;;  %v837_v50 = vsub.f32 %v2159_v55, %v830_v38 }
 0x954   :  { %v804_v43 = vpop.xlane.xlu0 %803 }
 0x955   :  { %v836_v44 = vsub.f32 %v834_v42, %v835_v41  ;;  %v805_v45 = vmul.f32 0.03125, %v804_v43  ;;  %v1188_v41 = vld [vmem:[%s2235_s2 + $0x18] ss:$0 sm:$0xff] }
 0x956   :  { %v808_v46 = vpop.xlane.xlu1 %807 }
 0x957   :  { %v838_v47 = vadd.f32 1e-05, %v836_v44  ;;  %v810_v48 = vmul.f32 %v805_v45, %v805_v45  ;;  %v809_v49 = vmul.f32 0.03125, %v808_v46  ;;  %v812_v58 = vsub.f32 %v2161_v56, %v805_v45  ;;  %v1050_v56 = vld [vmem:[#allocation2 + $0x158] sm:$0xff] }
 0x958   :  { %v1886_v52 = vpack.c.bf16 %v1050_v56, %v1049_v9 }
 0x959   :  { %1921 = vrsqrt.f32 %v838_v47  ;;  %v811_v2 = vsub.f32 %v809_v49, %v810_v48  ;;  %v1189_v48 = vld [vmem:[%s2235_s2 + $0x17] ss:$0 sm:$0xff] }
 0x95b   :  { %v813_v3 = vadd.f32 1e-05, %v811_v2 }
 0x95d   :  { %1923 = vrsqrt.f32 %v813_v3 }
 0x963   :  { %v1922_v51 = vpop.eup %1921 }
 0x964   :  { %v840_v54 = vmul.f32 %v1922_v51, %v837_v50 }
 0x966   :  { %v845_v59 = vmul.f32 %v1183_v53, %v840_v54 }
 0x967   :  { %v1924_v60 = vpop.eup %1923 }
 0x968   :  { %v850_v62 = vadd.f32 %v1184_v57, %v845_v59  ;;  %v815_v55 = vmul.f32 %v1924_v60, %v812_v58 }
 0x96a   :  { %1621 = vmatmul.mubr.f32.vlgmr.msra.gmra.mrb[8].mxu0 %v850_v62  ;;  %v820_v6 = vmul.f32 %v1181_v61, %v815_v55 }
 0x96c   :  { %v825_v8 = vadd.f32 %v1182_v5, %v820_v6 }
 0x96e   :  { %1586 = vmatmul.mubr.f32.vlgmr.msra.gmra.mrb[6].mxu1 %v825_v8 }
 0x96f   :  { %1884 = vmatpush3.bf16.msra.mxu1 %v1883_v7  ;;  %1655 = vmatprep.mubr.msk.f32.mxu1 %vm1977_vm0, %v1978_v1  ;;  %v1057_v1 = vld [vmem:[#allocation2 + $0x3c0] sm:$0xff] }
 0x970   :  { %1885 = vmatprep.subr.bf16.mxu1 %v1976_v0  ;;  %v1898_v21 = vpack.c.bf16 %v1058_v20, %v1057_v1 }
 0x973   :  { %1887 = vmatpush3.bf16.msra.mxu1 %v1886_v52 }
 0x974   :  { %1888 = vmatprep.subr.bf16.mxu1 %v1976_v0 }
 0x977   :  { %1890 = vmatpush3.bf16.msra.mxu1 %v1889_v12 }
 0x978   :  { %1891 = vmatprep.subr.bf16.mxu1 %v1976_v0 }
 0x97b   :  { %1893 = vmatpush3.bf16.msra.mxu1 %v1892_v16 }
 0x97c   :  { %1894 = vmatprep.subr.bf16.mxu1 %v1976_v0 }
 0x97f   :  { %1896 = vmatpush3.bf16.msra.mxu1 %v1895_v19 }
 0x980   :  { %1897 = vmatprep.subr.bf16.mxu1 %v1976_v0 }
 0x983   :  { %1899 = vmatpush3.bf16.msra.mxu1 %v1898_v21 }
 0x984   :  { %1900 = vmatprep.subr.bf16.mxu1 %v1976_v0 }
 0x987   :  { %1902 = vmatpush3.bf16.msra.mxu1 %v1901_v24 }
 0x988   :  { %1903 = vmatprep.subr.bf16.mxu1 %v1976_v0 }
 0x98b   :  { %1905 = vmatpush3.bf16.msra.mxu1 %v1904_v27 }
 0xa3d   :  { %v1027_v28 = vpop.f32.mrb[8].mxu0 }
 0xa3e   :  { %v1031_v13 = vadd.f32 %v1027_v28, %v2145_v40  ;;  %v1622_v30 = vpop.f32.mrb[9].mxu0 }
 0xa40   :  { %v1037_v31 = vadd.f32 %v1186_v29, %v1031_v13 }
 0xa41   :  { %v933_v32 = vpop.f32.mrb[6].mxu1 }
 0xa42   :  { %v1038_v34 = vmax.f32 %v1037_v31, 0.0  ;;  %v937_v0 = vadd.f32 %v933_v32, %v2145_v40  ;;  %v1587_v35 = vpop.f32.mrb[7].mxu1 }
 0xa44   :  { %v943_v36 = vadd.f32 %v1185_v33, %v937_v0  ;;  %1656 = vmatmul.mubr.f32.vlgmr.msra.gmra.mrb[8].mxu1 %v1038_v34 }
 0xa46   :  { %v944_v38 = vmax.f32 %v943_v36, 0.0 }
 0xa48   :  { %v1044_v39 = vmul.f32 %v1187_v37, %v944_v38 }
 0xa4a   :  { %1045 = vadd.xlane.f32.xlu1 %v1044_v39 }
 0xad7   :  { %v1046_v47 = vpop.xlane.xlu1 %1045 }
 0xb17   :  { %v1134_v42 = vpop.f32.mrb[8].mxu1 }
 0xb18   :  { %v1135_v43 = vadd.f32 %v1188_v41, %v1134_v42  ;;  %v1657_v44 = vpop.f32.mrb[9].mxu1 }
 0xb1a   :  { %1138 = vadd.xlane.f32.xlu0 %v1135_v43 }
 0xba7   :  { %v1139_v45 = vpop.xlane.xlu0 %1138 }
 0xba8   :  { %v1140_v40 = vmul.f32 0.125, %v1139_v45 }
 0xbaa   :  { %v1141_v46 = vsub.f32 %v1135_v43, %v1140_v40 }
 0xbac   :  { %v1142_v49 = vadd.f32 %v1141_v46, %v1046_v47 }
 0xbae   :  { %v1148_v2 = vadd.f32 %v1189_v48, %v1142_v49 }
 0xbb0   :  { %1149 = vst [vmem:[#allocation5] sm:$0xff] %v1148_v2 }
 0xbb1   :  { %1958 = shalt.err (!%p1955_p12)
}
 0xbb2   :  { %s1959_s25 = scalar_lea.hbm %s2236_s3, 128 }
 0xbb3   :  { %p1960_p13 = scmp.ne.s32.totalorder %s2236_s3, %s1959_s25  ;;  %p1963_p0 = scmp.lt.u32.totalorder %s1959_s25, %s2236_s3 }
 0xbb5   :  { %p1965_p1 = pnand %p1963_p0, %p1960_p13 }
 0xbb7   :  { %1968 = shalt.err (!%p1965_p1)
}
 0xbb8   :  { %1159 = dma.vmem_to_hbm [thread:$0]  %s1157_s21, 128, %s2236_s3, [#allocation4]  }
 0xbb9   :  { %1971 = dma.done.wait [#allocation4], 128  }
 0xbba   :  { %1972 = vsyncadd [#allocation4], 4294967168 }
 0xbbb   :  { %1163 = vsyncpa [#allocation3], 1 }
 0xbbc   :  { %1164 = vsyncpa [#allocation4], 1 }

</bundles_post_ra>
